<compile_context>
chip_gen: v7x
topology: tpu7x:2x2x1
jax: 0.10.0
libtpu: 0.0.40
codegen_flags: <defaults>
</compile_context>

<pallas_src>
import functools

import numpy as np
import jax
import jax.numpy as jnp
from jax import lax
from jax.experimental import pallas as pl
from jax.experimental.pallas import tpu as pltpu


# ------------------------- model geometry (static) ------------------------- #
H_IN, W_IN = 14, 22                       # spatial size implied by flatten-to-48
C1_OUT, C2_OUT = 3, 6
KH = KW = 3
H_C1, W_C1 = H_IN - 2, W_IN - 2           # 12, 20  (conv1 'VALID' output)
H_P1, W_P1 = H_C1 // 2, W_C1 // 2         # 6, 10   (after 2x2 pool)
H_C2, W_C2 = H_P1 - 2, W_P1 - 2           # 4, 8
H_P2, W_P2 = H_C2 // 2, W_C2 // 2         # 2, 4

M1 = H_IN * W_IN                          # 308  flattened input (c_in = 1)
N1_REAL = C1_OUT * H_P1 * W_P1            # 180  pooled layer-1 features
N2_REAL = C2_OUT * H_P2 * W_P2            # 48   pooled layer-2 features (== fc1 in)
BLK1 = 256                                # per-pool-offset block, padded to 128-mult
BLK2 = 128
D_FC1, D_OUT = 27, 2


# ----------------------------- fused Pallas kernel -------------------------- #

def fused_cnn_kernel(x_ref, w1_ref, b1_ref, w2_ref, b2_ref,
                     wf1_ref, bf1_ref, wf2_ref, bf2_ref, o_ref):
    # ---- conv1 + bias + ReLU: one lane-dense GEMM over all 4 pooling offsets ----
    y1 = jnp.dot(x_ref[...], w1_ref[...], preferred_element_type=jnp.float32)
    y1 = jnp.maximum(y1 + b1_ref[...], 0.0)                       # (tb, 4*BLK1)
    # 2x2 max-pool == elementwise max over the four 128-aligned offset blocks.
    h1 = jnp.maximum(jnp.maximum(y1[:, 0 * BLK1:1 * BLK1], y1[:, 1 * BLK1:2 * BLK1]),
                     jnp.maximum(y1[:, 2 * BLK1:3 * BLK1], y1[:, 3 * BLK1:4 * BLK1]))

    # ---- conv2 + bias + ReLU + pool, same scheme (h1 stays in VMEM/vregs) ----
    y2 = jnp.dot(h1, w2_ref[...], preferred_element_type=jnp.float32)
    y2 = jnp.maximum(y2 + b2_ref[...], 0.0)                       # (tb, 4*BLK2)
    h2 = jnp.maximum(jnp.maximum(y2[:, 0 * BLK2:1 * BLK2], y2[:, 1 * BLK2:2 * BLK2]),
                     jnp.maximum(y2[:, 2 * BLK2:3 * BLK2], y2[:, 3 * BLK2:4 * BLK2]))

    # h2 columns 0..47 are already in PyTorch NCHW .view(B, 48) order; padded
    # columns are exact zeros and hit zero rows of the (padded) fc1 weight.
    h3 = jnp.maximum(
        jnp.dot(h2, wf1_ref[...], preferred_element_type=jnp.float32) + bf1_ref[...],
        0.0)
    o_ref[...] = (jnp.dot(h3, wf2_ref[...], preferred_element_type=jnp.float32)
                  + bf2_ref[...])


# ---------------------- one-time host-side parameter prep ------------------- #

def prepare_params(w1, b1, w2, b2, wf1, bf1, wf2, bf2):
    """Fold conv+ReLU+maxpool stages into Toeplitz-style GEMM operands and
    pre-transpose / pad the FC weights.  Runs once, outside the forward path."""
    w1 = np.asarray(w1, np.float32); b1 = np.asarray(b1, np.float32)
    w2 = np.asarray(w2, np.float32); b2 = np.asarray(b2, np.float32)
    wf1 = np.asarray(wf1, np.float32); bf1 = np.asarray(bf1, np.float32)
    wf2 = np.asarray(wf2, np.float32); bf2 = np.asarray(bf2, np.float32)

    offsets = [(0, 0), (0, 1), (1, 0), (1, 1)]

    # Layer 1: rows index the NCHW-flattened input (c_in=1 -> h*W_IN + w);
    # columns are (pool_offset, c_out, ph, pw), each offset block padded to BLK1.
    w1_big = np.zeros((M1, 4 * BLK1), np.float32)
    b1_big = np.zeros((1, 4 * BLK1), np.float32)
    for off, (di, dj) in enumerate(offsets):
        col = off * BLK1
        for co in range(C1_OUT):
            for ph in range(H_P1):
                for pw in range(W_P1):
                    i, j = 2 * ph + di, 2 * pw + dj          # conv-output position
                    for ki in range(KH):
                        for kj in range(KW):
                            w1_big[(i + ki) * W_IN + (j + kj), col] = w1[co, 0, ki, kj]
                    b1_big[0, col] = b1[co]
                    col += 1

    # Layer 2: rows index h1's (c, ph, pw) layout (first N1_REAL of BLK1 columns);
    # columns are (pool_offset, c_out, ph, pw) padded to BLK2 per offset block.
    w2_big = np.zeros((BLK1, 4 * BLK2), np.float32)
    b2_big = np.zeros((1, 4 * BLK2), np.float32)
    for off, (di, dj) in enumerate(offsets):
        col = off * BLK2
        for co in range(C2_OUT):
            for ph in range(H_P2):
                for pw in range(W_P2):
                    i, j = 2 * ph + di, 2 * pw + dj
                    for ci in range(C1_OUT):
                        for ki in range(KH):
                            for kj in range(KW):
                                row = ci * (H_P1 * W_P1) + (i + ki) * W_P1 + (j + kj)
                                w2_big[row, col] = w2[co, ci, ki, kj]
                    b2_big[0, col] = b2[co]
                    col += 1

    # fc1: pad the 48 input rows up to BLK2 (extra rows hit the zero-padded h2 cols).
    wf1_pad = np.zeros((BLK2, D_FC1), np.float32)
    wf1_pad[:N2_REAL, :] = wf1.T
    bf1_r = bf1.reshape(1, D_FC1)
    wf2_t = wf2.T                                             # (27, 2)
    bf2_r = bf2.reshape(1, D_OUT)

    return tuple(jnp.asarray(a) for a in
                 (w1_big, b1_big, w2_big, b2_big, wf1_pad, bf1_r, wf2_t, bf2_r))


# --------------------------------- forward ---------------------------------- #

@jax.jit
def simple_cnn_forward(x_nchw, prepared):
    """Pallas implementation of simpleCNN.forward. x_nchw: (B, 1, 14, 22) float32."""
    B = x_nchw.shape[0]
    block_b = B if B <= 256 else 256          # batch tile (scales to large B)
    n_tiles = pl.cdiv(B, block_b)

    x_flat = x_nchw.reshape(B, M1)            # NCHW flatten; c_in == 1, no transpose

    def batch_spec(ncols):
        return pl.BlockSpec((block_b, ncols), lambda i: (i, 0))

    def full_spec(shape):
        return pl.BlockSpec(shape, lambda i: (0,) * len(shape))

    in_specs = [batch_spec(M1)] + [full_spec(p.shape) for p in prepared]

    return pl.pallas_call(
        fused_cnn_kernel,
        out_shape=jax.ShapeDtypeStruct((B, D_OUT), jnp.float32),
        grid=(n_tiles,),
        in_specs=in_specs,
        out_specs=batch_spec(D_OUT),
        compiler_params=pltpu.CompilerParams(dimension_semantics=("parallel",)),
    )(x_flat, *prepared)


# --------------------------- pure-JAX reference ------------------------------ #

def reference_forward(x_nchw, params):
    w1, b1, w2, b2, wf1, bf1, wf2, bf2 = params
    dn = ("NCHW", "OIHW", "NCHW")
    hi = lax.Precision.HIGHEST

    y = lax.conv_general_dilated(x_nchw, w1, (1, 1), "VALID",
                                 dimension_numbers=dn, precision=hi)
    y = jnp.maximum(y + b1.reshape(1, -1, 1, 1), 0.0)
    y = lax.reduce_window(y, -jnp.inf, lax.max, (1, 1, 2, 2), (1, 1, 2, 2), "VALID")

    y = lax.conv_general_dilated(y, w2, (1, 1), "VALID",
                                 dimension_numbers=dn, precision=hi)
    y = jnp.maximum(y + b2.reshape(1, -1, 1, 1), 0.0)
    y = lax.reduce_window(y, -jnp.inf, lax.max, (1, 1, 2, 2), (1, 1, 2, 2), "VALID")

    y = y.reshape(y.shape[0], 48)
    y = jnp.maximum(y @ wf1.T + bf1, 0.0)
    return y @ wf2.T + bf2


# ----------------------------------- main ------------------------------------ #

if __name__ == "__main__":
    key = jax.random.PRNGKey(0)
    keys = jax.random.split(key, 9)

    # Deterministic synthetic parameters (PyTorch shape conventions).
    w1 = 0.2 * jax.random.normal(keys[0], (3, 1, 3, 3), jnp.float32)    # conv1.weight
    b1 = 0.1 * jax.random.normal(keys[1], (3,), jnp.float32)            # conv1.bias
    w2 = 0.2 * jax.random.normal(keys[2], (6, 3, 3, 3), jnp.float32)    # conv2.weight
    b2 = 0.1 * jax.random.normal(keys[3], (6,), jnp.float32)            # conv2.bias
    wf1 = 0.2 * jax.random.normal(keys[4], (27, 48), jnp.float32)       # fc1.weight
    bf1 = 0.1 * jax.random.normal(keys[5], (27,), jnp.float32)          # fc1.bias
    wf2 = 0.2 * jax.random.normal(keys[6], (2, 27), jnp.float32)        # fc2.weight
    bf2 = 0.1 * jax.random.normal(keys[7], (2,), jnp.float32)           # fc2.bias
    params = (w1, b1, w2, b2, wf1, bf1, wf2, bf2)

    # One-time parameter preparation (outside the forward path).
    prepared = prepare_params(*params)

    # Input: (B=2, C=1, H=14, W=22) -> two conv/pool stages -> 6*2*4 = 48 features.
    x = jax.random.normal(keys[8], (2, 1, 14, 22), jnp.float32)

    out = jax.block_until_ready(simple_cnn_forward(x, prepared))
    ref = jax.block_until_ready(reference_forward(x, params))

    assert out.shape == (2, 2), out.shape
    assert jnp.allclose(out, ref, rtol=1e-2, atol=1e-2), (out, ref)

    print("KERNEL_OK")
</pallas_src>

<mosaic_0001>
module attributes {stable_mosaic.version = 11 : i64} {
  func.func @fused_cnn_kernel(%arg0: i32, %arg1: memref<2x308xf32, #tpu.memory_space<vmem>>, %arg2: memref<308x1024xf32, #tpu.memory_space<vmem>>, %arg3: memref<1x1024xf32, #tpu.memory_space<vmem>>, %arg4: memref<256x512xf32, #tpu.memory_space<vmem>>, %arg5: memref<1x512xf32, #tpu.memory_space<vmem>>, %arg6: memref<128x27xf32, #tpu.memory_space<vmem>>, %arg7: memref<1x27xf32, #tpu.memory_space<vmem>>, %arg8: memref<27x2xf32, #tpu.memory_space<vmem>>, %arg9: memref<1x2xf32, #tpu.memory_space<vmem>>, %arg10: memref<2x2xf32, #tpu.memory_space<vmem>>) attributes {dimension_semantics = [#tpu.dimension_semantics<parallel>], iteration_bounds = array<i64: 1>, scalar_prefetch = 0 : i64, scratch_operands = 0 : i64, tpu.core_type = #tpu.core_type<tc>, window_params = [{transform_indices = @transform_0, window_bounds = array<i64: 2, 308>}, {pipeline_mode = #tpu.pipeline_mode<synchronous>, transform_indices = @transform_1, window_bounds = array<i64: 308, 1024>}, {pipeline_mode = #tpu.pipeline_mode<synchronous>, transform_indices = @transform_2, window_bounds = array<i64: 1, 1024>}, {pipeline_mode = #tpu.pipeline_mode<synchronous>, transform_indices = @transform_3, window_bounds = array<i64: 256, 512>}, {pipeline_mode = #tpu.pipeline_mode<synchronous>, transform_indices = @transform_4, window_bounds = array<i64: 1, 512>}, {pipeline_mode = #tpu.pipeline_mode<synchronous>, transform_indices = @transform_5, window_bounds = array<i64: 128, 27>}, {pipeline_mode = #tpu.pipeline_mode<synchronous>, transform_indices = @transform_6, window_bounds = array<i64: 1, 27>}, {pipeline_mode = #tpu.pipeline_mode<synchronous>, transform_indices = @transform_7, window_bounds = array<i64: 27, 2>}, {pipeline_mode = #tpu.pipeline_mode<synchronous>, transform_indices = @transform_8, window_bounds = array<i64: 1, 2>}, {transform_indices = @transform_9, window_bounds = array<i64: 2, 2>}]} {
    %c0 = arith.constant 0 : index
    %c0_0 = arith.constant 0 : index
    %0 = vector.load %arg1[%c0, %c0_0] : memref<2x308xf32, #tpu.memory_space<vmem>>, vector<2x308xf32>
    %c0_1 = arith.constant 0 : index
    %c0_2 = arith.constant 0 : index
    %1 = vector.load %arg2[%c0_1, %c0_2] : memref<308x1024xf32, #tpu.memory_space<vmem>>, vector<308x1024xf32>
    %cst = arith.constant dense<0.000000e+00> : vector<2x1024xf32>
    %2 = tpu.matmul %0, %1, %cst {dimension_numbers = #tpu.dot_dimension_numbers<[1], [0], [0], [1], [0, 0, 1, 1], [], []>} : vector<2x308xf32>, vector<308x1024xf32>, vector<2x1024xf32> -> vector<2x1024xf32>
    %c0_3 = arith.constant 0 : index
    %c0_4 = arith.constant 0 : index
    %3 = vector.load %arg3[%c0_3, %c0_4] : memref<1x1024xf32, #tpu.memory_space<vmem>>, vector<1x1024xf32>
    %4 = vector.broadcast %3 : vector<1x1024xf32> to vector<2x1024xf32>
    %5 = arith.addf %2, %4 : vector<2x1024xf32>
    %cst_5 = arith.constant 0.000000e+00 : f32
    %6 = vector.broadcast %cst_5 : f32 to vector<2x1024xf32>
    %7 = arith.maximumf %5, %6 : vector<2x1024xf32>
    %8 = vector.extract_strided_slice %7 {offsets = [0, 0], sizes = [2, 256], strides = [1, 1]} : vector<2x1024xf32> to vector<2x256xf32>
    %9 = vector.extract_strided_slice %7 {offsets = [0, 256], sizes = [2, 256], strides = [1, 1]} : vector<2x1024xf32> to vector<2x256xf32>
    %10 = arith.maximumf %8, %9 : vector<2x256xf32>
    %11 = vector.extract_strided_slice %7 {offsets = [0, 512], sizes = [2, 256], strides = [1, 1]} : vector<2x1024xf32> to vector<2x256xf32>
    %12 = vector.extract_strided_slice %7 {offsets = [0, 768], sizes = [2, 256], strides = [1, 1]} : vector<2x1024xf32> to vector<2x256xf32>
    %13 = arith.maximumf %11, %12 : vector<2x256xf32>
    %14 = arith.maximumf %10, %13 : vector<2x256xf32>
    %c0_6 = arith.constant 0 : index
    %c0_7 = arith.constant 0 : index
    %15 = vector.load %arg4[%c0_6, %c0_7] : memref<256x512xf32, #tpu.memory_space<vmem>>, vector<256x512xf32>
    %cst_8 = arith.constant dense<0.000000e+00> : vector<2x512xf32>
    %16 = tpu.matmul %14, %15, %cst_8 {dimension_numbers = #tpu.dot_dimension_numbers<[1], [0], [0], [1], [0, 0, 1, 1], [], []>} : vector<2x256xf32>, vector<256x512xf32>, vector<2x512xf32> -> vector<2x512xf32>
    %c0_9 = arith.constant 0 : index
    %c0_10 = arith.constant 0 : index
    %17 = vector.load %arg5[%c0_9, %c0_10] : memref<1x512xf32, #tpu.memory_space<vmem>>, vector<1x512xf32>
    %18 = vector.broadcast %17 : vector<1x512xf32> to vector<2x512xf32>
    %19 = arith.addf %16, %18 : vector<2x512xf32>
    %cst_11 = arith.constant 0.000000e+00 : f32
    %20 = vector.broadcast %cst_11 : f32 to vector<2x512xf32>
    %21 = arith.maximumf %19, %20 : vector<2x512xf32>
    %22 = vector.extract_strided_slice %21 {offsets = [0, 0], sizes = [2, 128], strides = [1, 1]} : vector<2x512xf32> to vector<2x128xf32>
    %23 = vector.extract_strided_slice %21 {offsets = [0, 128], sizes = [2, 128], strides = [1, 1]} : vector<2x512xf32> to vector<2x128xf32>
    %24 = arith.maximumf %22, %23 : vector<2x128xf32>
    %25 = vector.extract_strided_slice %21 {offsets = [0, 256], sizes = [2, 128], strides = [1, 1]} : vector<2x512xf32> to vector<2x128xf32>
    %26 = vector.extract_strided_slice %21 {offsets = [0, 384], sizes = [2, 128], strides = [1, 1]} : vector<2x512xf32> to vector<2x128xf32>
    %27 = arith.maximumf %25, %26 : vector<2x128xf32>
    %28 = arith.maximumf %24, %27 : vector<2x128xf32>
    %c0_12 = arith.constant 0 : index
    %c0_13 = arith.constant 0 : index
    %29 = vector.load %arg6[%c0_12, %c0_13] : memref<128x27xf32, #tpu.memory_space<vmem>>, vector<128x27xf32>
    %cst_14 = arith.constant dense<0.000000e+00> : vector<2x27xf32>
    %30 = tpu.matmul %28, %29, %cst_14 {dimension_numbers = #tpu.dot_dimension_numbers<[1], [0], [0], [1], [0, 0, 1, 1], [], []>} : vector<2x128xf32>, vector<128x27xf32>, vector<2x27xf32> -> vector<2x27xf32>
    %c0_15 = arith.constant 0 : index
    %c0_16 = arith.constant 0 : index
    %31 = vector.load %arg7[%c0_15, %c0_16] : memref<1x27xf32, #tpu.memory_space<vmem>>, vector<1x27xf32>
    %32 = vector.broadcast %31 : vector<1x27xf32> to vector<2x27xf32>
    %33 = arith.addf %30, %32 : vector<2x27xf32>
    %cst_17 = arith.constant 0.000000e+00 : f32
    %34 = vector.broadcast %cst_17 : f32 to vector<2x27xf32>
    %35 = arith.maximumf %33, %34 : vector<2x27xf32>
    %c0_18 = arith.constant 0 : index
    %c0_19 = arith.constant 0 : index
    %36 = vector.load %arg8[%c0_18, %c0_19] : memref<27x2xf32, #tpu.memory_space<vmem>>, vector<27x2xf32>
    %cst_20 = arith.constant dense<0.000000e+00> : vector<2x2xf32>
    %37 = tpu.matmul %35, %36, %cst_20 {dimension_numbers = #tpu.dot_dimension_numbers<[1], [0], [0], [1], [0, 0, 1, 1], [], []>} : vector<2x27xf32>, vector<27x2xf32>, vector<2x2xf32> -> vector<2x2xf32>
    %c0_21 = arith.constant 0 : index
    %c0_22 = arith.constant 0 : index
    %38 = vector.load %arg9[%c0_21, %c0_22] : memref<1x2xf32, #tpu.memory_space<vmem>>, vector<1x2xf32>
    %39 = vector.broadcast %38 : vector<1x2xf32> to vector<2x2xf32>
    %40 = arith.addf %37, %39 : vector<2x2xf32>
    %c0_23 = arith.constant 0 : index
    %c0_24 = arith.constant 0 : index
    %41 = vector.load %arg10[%c0_23, %c0_24] : memref<2x2xf32, #tpu.memory_space<vmem>>, vector<2x2xf32>
    tpu.vector_store %arg10[%c0_23, %c0_24], %40 {strides = array<i32>} : memref<2x2xf32, #tpu.memory_space<vmem>>, vector<2x2xf32>,
    return
  }
  func.func @transform_0(%arg0: i32) -> (i32, i32) {
    %c0_i32 = arith.constant 0 : i32
    %c0_i32_0 = arith.constant 0 : i32
    return %arg0, %c0_i32 : i32, i32
  }
  func.func @transform_1(%arg0: i32) -> (i32, i32) {
    %c0_i32 = arith.constant 0 : i32
    %c0_i32_0 = arith.constant 0 : i32
    %c0_i32_1 = arith.constant 0 : i32
    return %c0_i32, %c0_i32_0 : i32, i32
  }
  func.func @transform_2(%arg0: i32) -> (i32, i32) {
    %c0_i32 = arith.constant 0 : i32
    %c0_i32_0 = arith.constant 0 : i32
    %c0_i32_1 = arith.constant 0 : i32
    return %c0_i32, %c0_i32_0 : i32, i32
  }
  func.func @transform_3(%arg0: i32) -> (i32, i32) {
    %c0_i32 = arith.constant 0 : i32
    %c0_i32_0 = arith.constant 0 : i32
    %c0_i32_1 = arith.constant 0 : i32
    return %c0_i32, %c0_i32_0 : i32, i32
  }
  func.func @transform_4(%arg0: i32) -> (i32, i32) {
    %c0_i32 = arith.constant 0 : i32
    %c0_i32_0 = arith.constant 0 : i32
    %c0_i32_1 = arith.constant 0 : i32
    return %c0_i32, %c0_i32_0 : i32, i32
  }
  func.func @transform_5(%arg0: i32) -> (i32, i32) {
    %c0_i32 = arith.constant 0 : i32
    %c0_i32_0 = arith.constant 0 : i32
    %c0_i32_1 = arith.constant 0 : i32
    return %c0_i32, %c0_i32_0 : i32, i32
  }
  func.func @transform_6(%arg0: i32) -> (i32, i32) {
    %c0_i32 = arith.constant 0 : i32
    %c0_i32_0 = arith.constant 0 : i32
    %c0_i32_1 = arith.constant 0 : i32
    return %c0_i32, %c0_i32_0 : i32, i32
  }
  func.func @transform_7(%arg0: i32) -> (i32, i32) {
    %c0_i32 = arith.constant 0 : i32
    %c0_i32_0 = arith.constant 0 : i32
    %c0_i32_1 = arith.constant 0 : i32
    return %c0_i32, %c0_i32_0 : i32, i32
  }
  func.func @transform_8(%arg0: i32) -> (i32, i32) {
    %c0_i32 = arith.constant 0 : i32
    %c0_i32_0 = arith.constant 0 : i32
    %c0_i32_1 = arith.constant 0 : i32
    return %c0_i32, %c0_i32_0 : i32, i32
  }
  func.func @transform_9(%arg0: i32) -> (i32, i32) {
    %c0_i32 = arith.constant 0 : i32
    %c0_i32_0 = arith.constant 0 : i32
    return %arg0, %c0_i32 : i32, i32
  }
}

</mosaic_0001>

<bundles_post_ra>
// kernel: simple_cnn_forward.1
= control target key start
LH: loop header
LB: loop body
LE: loop exit
PB: predicated region body
PF: predicated region fallthrough
CT: control target
= control target key end

     0   :  { %14 = vsyncpa [#allocation3], 0  ;;  %s2631_s0 = inlined_call_operand.vmem [shape: f32[2,308], index: 0, kind: input, shape index: {}]   ;;  %s2632_s1 = inlined_call_operand.hbm [shape: f32[308,1024], index: 1, kind: input, shape index: {}]   ;;  %s2633_s2 = inlined_call_operand.hbm [shape: f32[1,1024], index: 2, kind: input, shape index: {}]   ;;  %s2634_s3 = inlined_call_operand.hbm [shape: f32[256,512], index: 3, kind: input, shape index: {}]   ;;  %s2635_s4 = inlined_call_operand.hbm [shape: f32[1,512], index: 4, kind: input, shape index: {}]   ;;  %s2636_s5 = inlined_call_operand.vmem [shape: f32[128,27], index: 5, kind: input, shape index: {}]   ;;  %s2637_s6 = inlined_call_operand.hbm [shape: f32[1,27], index: 6, kind: input, shape index: {}]   ;;  %s2638_s7 = inlined_call_operand.vmem [shape: f32[27,2], index: 7, kind: input, shape index: {}]   ;;  %s2639_s8 = inlined_call_operand.hbm [shape: f32[1,2], index: 8, kind: input, shape index: {}]   ;;  %s2640_s9 = inlined_call_operand.hbm [shape: f32[2,2], index: 9, kind: output, shape index: {}]  }
   0x1   :  { %15 = vsyncpa [#allocation6], 0 }
   0x2   :  { %16 = vsyncpa [#allocation9], 0 }
   0x3   :  { %17 = vsyncpa [#allocation12], 0 }
   0x4   :  { %18 = vsyncpa [#allocation4], 0  ;;  %s2337_s30 = smov [#allocation5]   ;;  %s2338_s11 = smov [#allocation8]  }
   0x5   :  { %s39_s10 = sshll.u32 %s2337_s30, 4  ;;  %s61_s12 = sshll.u32 %s2338_s11, 4  ;;  %s40_s10 = int_to_ptr.vmem [resolvable:$true] %s39_s10  ;;  %s62_s12 = int_to_ptr.vmem [resolvable:$true] %s61_s12 }
   0x6   :  { %s2173_s15 = scalar_lea.hbm %s2633_s2, 128 }
   0x7   :  { %p2174_p0 = scmp.ne.s32.totalorder %s2633_s2, %s2173_s15  ;;  %p2177_p1 = scmp.lt.u32.totalorder %s2173_s15, %s2633_s2 }
   0x9   :  { %p2179_p2 = pnand %p2177_p1, %p2174_p0 }
   0xb   :  { %2182 = shalt.err (!%p2179_p2)
}
   0xc   :  { %s2183_s20 = scalar_lea.vmem %s40_s10, 128  ;;  %p2188_p4 = scmp.lt.s32.totalorder %s40_s10, %s40_s10 }
   0xd   :  { %p2184_p3 = scmp.ne.s32.totalorder %s40_s10, %s2183_s20  ;;  %p2189_p5 = scmp.lt.s32.totalorder %s2183_s20, %s2183_s20 }
   0xf   :  { %p2190_p6 = por %p2189_p5, %p2188_p4 }
  0x11   :  { %p2191_p7 = pnand %p2190_p6, %p2184_p3 }
  0x13   :  { %2194 = shalt.err (!%p2191_p7)
}
  0x14   :  { %42 = dma.hbm_to_vmem [thread:$0]  %s2633_s2, 128, %s40_s10, [#allocation6]  }
  0x15   :  { %s2195_s25 = scalar_lea.hbm %s2635_s4, 64 }
  0x16   :  { %p2196_p8 = scmp.ne.s32.totalorder %s2635_s4, %s2195_s25  ;;  %p2199_p9 = scmp.lt.u32.totalorder %s2195_s25, %s2635_s4 }
  0x18   :  { %p2201_p10 = pnand %p2199_p9, %p2196_p8 }
  0x1a   :  { %2204 = shalt.err (!%p2201_p10)
}
  0x1b   :  { %s2205_s30 = scalar_lea.vmem %s62_s12, 64  ;;  %p2210_p12 = scmp.lt.s32.totalorder %s62_s12, %s62_s12 }
  0x1c   :  { %p2206_p11 = scmp.ne.s32.totalorder %s62_s12, %s2205_s30  ;;  %p2211_p13 = scmp.lt.s32.totalorder %s2205_s30, %s2205_s30 }
  0x1e   :  { %p2212_p0 = por %p2211_p13, %p2210_p12 }
  0x20   :  { %p2213_p1 = pnand %p2212_p0, %p2206_p11 }
  0x22   :  { %2216 = shalt.err (!%p2213_p1)
}
  0x23   :  { %64 = dma.hbm_to_vmem [thread:$0]  %s2635_s4, 64, %s62_s12, [#allocation9]  }
  0x24   :  { %s2339_s11 = smov [#allocation2]   ;;  %s2217_s16 = scalar_lea.hbm %s2632_s1, 39936 }
  0x25   :  { %s26_s13 = sshll.u32 %s2339_s11, 4  ;;  %p2218_p2 = scmp.ne.s32.totalorder %s2632_s1, %s2217_s16  ;;  %s27_s13 = int_to_ptr.vmem [resolvable:$true] %s26_s13 }
  0x26   :  { %p2221_p3 = scmp.lt.u32.totalorder %s2217_s16, %s2632_s1 }
  0x28   :  { %p2223_p4 = pnand %p2221_p3, %p2218_p2 }
  0x2a   :  { %2226 = shalt.err (!%p2223_p4)
}
  0x2b   :  { %s2227_s21 = scalar_lea.vmem %s27_s13, 39936  ;;  %p2232_p6 = scmp.lt.s32.totalorder %s27_s13, %s27_s13 }
  0x2c   :  { %p2228_p5 = scmp.ne.s32.totalorder %s27_s13, %s2227_s21  ;;  %p2233_p7 = scmp.lt.s32.totalorder %s2227_s21, %s2227_s21 }
  0x2e   :  { %p2234_p8 = por %p2233_p7, %p2232_p6 }
  0x30   :  { %p2235_p9 = pnand %p2234_p8, %p2228_p5 }
  0x32   :  { %2238 = shalt.err (!%p2235_p9)
}
  0x33   :  { %s2340_s4 = smov 1024   ;;  %s2341_s12 = smov 64  }
  0x34   :  { %32 = dma.hbm_to_vmem [thread:$0]  %s2632_s1, 39936, %s27_s13, [#allocation3], %s2340_s4, %s2340_s4, %s2341_s12  }
  0x35   :  { %s2342_s24 = smov [#allocation7]   ;;  %s2239_s28 = scalar_lea.hbm %s2634_s3, 16384 }
  0x36   :  { %s48_s25 = sshll.u32 %s2342_s24, 4  ;;  %p2240_p10 = scmp.ne.s32.totalorder %s2634_s3, %s2239_s28  ;;  %s49_s25 = int_to_ptr.vmem [resolvable:$true] %s48_s25 }
  0x37   :  { %p2243_p11 = scmp.lt.u32.totalorder %s2239_s28, %s2634_s3 }
  0x39   :  { %p2245_p12 = pnand %p2243_p11, %p2240_p10 }
  0x3b   :  { %2248 = shalt.err (!%p2245_p12)
}
  0x3c   :  { %s2249_s11 = scalar_lea.vmem %s49_s25, 16384  ;;  %p2254_p0 = scmp.lt.s32.totalorder %s49_s25, %s49_s25 }
  0x3d   :  { %p2250_p13 = scmp.ne.s32.totalorder %s49_s25, %s2249_s11  ;;  %p2255_p1 = scmp.lt.s32.totalorder %s2249_s11, %s2249_s11 }
  0x3f   :  { %p2256_p2 = por %p2255_p1, %p2254_p0 }
  0x41   :  { %p2257_p3 = pnand %p2256_p2, %p2250_p13 }
  0x43   :  { %2260 = shalt.err (!%p2257_p3)
}
  0x44   :  { %s2343_s1 = smov 512   ;;  %s2344_s13 = smov 32  }
  0x45   :  { %54 = dma.hbm_to_vmem [thread:$0]  %s2634_s3, 16384, %s49_s25, [#allocation6], %s2343_s1, %s2343_s1, %s2344_s13  }
  0x46   :  { %s2345_s16 = smov [#allocation10]   ;;  %s2346_s18 = smov [#allocation11]  }
  0x47   :  { %s73_s17 = sshll.u32 %s2345_s16, 4  ;;  %s85_s19 = sshll.u32 %s2346_s18, 4  ;;  %s74_s17 = int_to_ptr.vmem [resolvable:$true] %s73_s17  ;;  %s86_s19 = int_to_ptr.vmem [resolvable:$true] %s85_s19 }
  0x48   :  { %s2261_s4 = scalar_lea.hbm %s2637_s6, 16 }
  0x49   :  { %p2262_p4 = scmp.ne.s32.totalorder %s2637_s6, %s2261_s4  ;;  %p2265_p5 = scmp.lt.u32.totalorder %s2261_s4, %s2637_s6 }
  0x4b   :  { %p2267_p6 = pnand %p2265_p5, %p2262_p4 }
  0x4d   :  { %2270 = shalt.err (!%p2267_p6)
}
  0x4e   :  { %s2271_s3 = scalar_lea.vmem %s74_s17, 16  ;;  %s2275_s25 = scalar_lea.vmem %s74_s17, 32 }
  0x4f   :  { %p2272_p7 = scmp.ne.s32.totalorder %s74_s17, %s2271_s3  ;;  %p2276_p8 = scmp.lt.s32.totalorder %s74_s17, %s74_s17 }
  0x50   :  { %p2277_p9 = scmp.lt.s32.totalorder %s2275_s25, %s2271_s3 }
  0x52   :  { %p2278_p10 = por %p2277_p9, %p2276_p8 }
  0x54   :  { %p2279_p11 = pnand %p2278_p10, %p2272_p7 }
  0x56   :  { %2282 = shalt.err (!%p2279_p11)
}
  0x57   :  { %76 = dma.hbm_to_vmem [thread:$0]  %s2637_s6, 16, %s74_s17, [#allocation9]  }
  0x58   :  { %s2283_s30 = scalar_lea.hbm %s2639_s8, 16 }
  0x59   :  { %p2284_p12 = scmp.ne.s32.totalorder %s2639_s8, %s2283_s30  ;;  %p2287_p13 = scmp.lt.u32.totalorder %s2283_s30, %s2639_s8 }
  0x5b   :  { %p2289_p0 = pnand %p2287_p13, %p2284_p12 }
  0x5d   :  { %2292 = shalt.err (!%p2289_p0)
}
  0x5e   :  { %s2293_s13 = scalar_lea.vmem %s86_s19, 16  ;;  %s2297_s14 = scalar_lea.vmem %s86_s19, 32 }
  0x5f   :  { %p2294_p1 = scmp.ne.s32.totalorder %s86_s19, %s2293_s13  ;;  %p2298_p2 = scmp.lt.s32.totalorder %s86_s19, %s86_s19 }
  0x60   :  { %p2299_p3 = scmp.lt.s32.totalorder %s2297_s14, %s2293_s13 }
  0x62   :  { %p2300_p4 = por %p2299_p3, %p2298_p2 }
  0x64   :  { %p2301_p5 = pnand %p2300_p4, %p2294_p1 }
  0x66   :  { %2304 = shalt.err (!%p2301_p5)
}
  0x67   :  { %88 = dma.hbm_to_vmem [thread:$0]  %s2639_s8, 16, %s86_s19, [#allocation12]  }
  0x68   :  { %2327 = dma.done.wait [#allocation3], 39936  }
  0x69   :  { %2328 = vsyncadd [#allocation3], 4294927360 }
  0x6a   :  { %2329 = dma.done.wait [#allocation6], 16512  }
  0x6b   :  { %2330 = vsyncadd [#allocation6], 4294950784 }
  0x6c   :  { %2331 = dma.done.wait [#allocation9], 80  }
  0x6d   :  { %2332 = vsyncadd [#allocation9], 4294967216 }
  0x6e   :  { %2333 = dma.done.wait [#allocation12], 16  }
  0x6f   :  { %2334 = vsyncadd [#allocation12], 4294967280  ;;  %v2347_v0 = vmov 0.0   ;;  %v109_v1 = vld [vmem:[#allocation2 + $0x8] sm:$0xff]  ;;  %v108_v6 = vld [vmem:[#allocation2] sm:$0xff]  ;;  %v422_v8 = vlaneseq  ;;  %vm484_vm0 = vcmask 1043456  }
  0x70   :  { %644 = vmatprep.mubr.f32.mxu1 %v2347_v0  ;;  %v117_v2 = vld [vmem:[#allocation2 + $0x48] sm:$0xff]  ;;  %v116_v7 = vld [vmem:[#allocation2 + $0x40] sm:$0xff]  ;;  %v2348_v9 = vmov 1983009808   ;;  %v111_v50 = vld [vmem:[#allocation2 + $0x18] sm:$0xff]  ;;  %vm481_vm1 = vcmask 424960  }
  0x71   :  { %v365_v3 = vld [vmem:[#allocation2 + $0x808] sm:$0xff]  ;;  %v1677_v4 = vpack.c.bf16 %v117_v2, %v109_v1  ;;  %v465_v10 = vunpack.c.l.s4 %v2348_v9  ;;  %v1679_v12 = vpack.c.bf16 %v116_v7, %v108_v6  ;;  %v364_v13 = vld [vmem:[#allocation2 + $0x800] sm:$0xff]  ;;  %v2476_v29 = vshrl.u32 %v422_v8, 7  ;;  %v119_v53 = vld [vmem:[#allocation2 + $0x58] sm:$0xff]  ;;  %s2352_s3 = smov [#allocation13]  }
  0x72   :  { %v373_v5 = vld [vmem:[#allocation2 + $0x848] sm:$0xff]  ;;  %v372_v14 = vld [vmem:[#allocation2 + $0x840] sm:$0xff]  ;;  %v110_v54 = vld [vmem:[#allocation2 + $0x10] sm:$0xff]  ;;  %vm2350_vm2 = vmmov 0   ;;  %vm1499_vm3 = vcmask 1042432   ;;  %vm2351_vm4 = vmmov 1  }
  0x73   :  { %v1741_v11 = vpack.c.bf16 %v373_v5, %v365_v3  ;;  %v125_v15 = vld [vmem:[#allocation2 + $0x88] sm:$0xff]  ;;  %1678 = vmatprep.subr.bf16.mxu0 %v1677_v4  ;;  %v1743_v16 = vpack.c.bf16 %v372_v14, %v364_v13  ;;  %v124_v22 = vld [vmem:[#allocation2 + $0x80] sm:$0xff]  ;;  %v466_v30 = vunpack.c.0.s8 %v465_v10  ;;  %v118_v57 = vld [vmem:[#allocation2 + $0x50] sm:$0xff]  ;;  %v1753_v3 = vpack.c.bf16 %v119_v53, %v111_v50  ;;  %s1581_s25 = sshll.u32 %s2352_s3, 4  ;;  %s1582_s25 = int_to_ptr.vmem [resolvable:$true] %s1581_s25 }
  0x74   :  { %v133_v17 = vld [vmem:[#allocation2 + $0xc8] sm:$0xff]  ;;  %1680 = vmatpush1.bf16.msra.mxu0 %v1679_v12  ;;  %v132_v23 = vld [vmem:[#allocation2 + $0xc0] sm:$0xff]  ;;  %v127_v62 = vld [vmem:[#allocation2 + $0x98] sm:$0xff]  ;;  %v1755_v7 = vpack.c.bf16 %v118_v57, %v110_v54  ;;  %vm1495_vm6 = vcmask 220160   ;;  %vm1573_vm7 = vcmask 9216   ;;  %p2310_p7 = scmp.lt.s32.totalorder %s1582_s25, %s1582_s25 }
  0x75   :  { %v381_v18 = vld [vmem:[#allocation2 + $0x888] sm:$0xff]  ;;  %1742 = vmatprep.subr.bf16.mxu1 %v1741_v11  ;;  %v1681_v20 = vpack.c.bf16 %v133_v17, %v125_v15  ;;  %v380_v24 = vld [vmem:[#allocation2 + $0x880] sm:$0xff]  ;;  %v1683_v25 = vpack.c.bf16 %v132_v23, %v124_v22  ;;  %v469_v47 = vsub.s32 %v466_v30, %v2476_v29  ;;  %v135_v63 = vld [vmem:[#allocation2 + $0xd8] sm:$0xff] }
  0x76   :  { %v389_v19 = vld [vmem:[#allocation2 + $0x8c8] sm:$0xff]  ;;  %1744 = vmatpush1.bf16.msra.mxu1 %v1743_v16  ;;  %v388_v26 = vld [vmem:[#allocation2 + $0x8c0] sm:$0xff]  ;;  %v1757_v9 = vpack.c.bf16 %v135_v63, %v127_v62  ;;  %v126_v10 = vld [vmem:[#allocation2 + $0x90] sm:$0xff] }
  0x77   :  { %v1745_v21 = vpack.c.bf16 %v389_v19, %v381_v18  ;;  %v141_v27 = vld [vmem:[#allocation2 + $0x108] sm:$0xff]  ;;  %1682 = vmatprep.subr.bf16.mxu0 %v1681_v20  ;;  %v1747_v31 = vpack.c.bf16 %v388_v26, %v380_v24  ;;  %v140_v35 = vld [vmem:[#allocation2 + $0x100] sm:$0xff]  ;;  %v134_v11 = vld [vmem:[#allocation2 + $0xd0] sm:$0xff] }
  0x78   :  { %v149_v28 = vld [vmem:[#allocation2 + $0x148] sm:$0xff]  ;;  %v148_v37 = vld [vmem:[#allocation2 + $0x140] sm:$0xff]  ;;  %1684 = vmatpush1.bf16.msra.mxu0 %v1683_v25  ;;  %v143_v15 = vld [vmem:[#allocation2 + $0x118] sm:$0xff]  ;;  %v1759_v19 = vpack.c.bf16 %v134_v11, %v126_v10 }
  0x79   :  { %1746 = vmatprep.subr.bf16.mxu1 %v1745_v21  ;;  %v1685_v32 = vpack.c.bf16 %v149_v28, %v141_v27  ;;  %v397_v33 = vld [vmem:[#allocation2 + $0x908] sm:$0xff]  ;;  %v396_v38 = vld [vmem:[#allocation2 + $0x900] sm:$0xff]  ;;  %v1687_v40 = vpack.c.bf16 %v148_v37, %v140_v35  ;;  %v151_v16 = vld [vmem:[#allocation2 + $0x158] sm:$0xff] }
  0x7a   :  { %v405_v34 = vld [vmem:[#allocation2 + $0x948] sm:$0xff]  ;;  %v404_v39 = vld [vmem:[#allocation2 + $0x940] sm:$0xff]  ;;  %1748 = vmatpush1.bf16.msra.mxu1 %v1747_v31  ;;  %v1761_v21 = vpack.c.bf16 %v151_v16, %v143_v15  ;;  %v142_v22 = vld [vmem:[#allocation2 + $0x110] sm:$0xff] }
  0x7b   :  { %v1749_v36 = vpack.c.bf16 %v405_v34, %v397_v33  ;;  %v157_v41 = vld [vmem:[#allocation2 + $0x188] sm:$0xff]  ;;  %1686 = vmatprep.subr.bf16.mxu0 %v1685_v32  ;;  %v1751_v43 = vpack.c.bf16 %v404_v39, %v396_v38  ;;  %v156_v45 = vld [vmem:[#allocation2 + $0x180] sm:$0xff]  ;;  %v150_v23 = vld [vmem:[#allocation2 + $0x150] sm:$0xff] }
  0x7c   :  { %v165_v42 = vld [vmem:[#allocation2 + $0x1c8] sm:$0xff]  ;;  %v164_v46 = vld [vmem:[#allocation2 + $0x1c0] sm:$0xff]  ;;  %1688 = vmatpush1.bf16.msra.mxu0 %v1687_v40  ;;  %v159_v27 = vld [vmem:[#allocation2 + $0x198] sm:$0xff]  ;;  %v1763_v32 = vpack.c.bf16 %v150_v23, %v142_v22 }
  0x7d   :  { %v1689_v44 = vpack.c.bf16 %v165_v42, %v157_v41  ;;  %1750 = vmatprep.subr.bf16.mxu1 %v1749_v36  ;;  %v413_v48 = vld [vmem:[#allocation2 + $0x988] sm:$0xf]  ;;  %v107_v49 = vld [vmem:[%s2631_s0] sm:$0x3f]  ;;  %v1691_v56 = vpack.c.bf16 %v164_v46, %v156_v45  ;;  %v167_v28 = vld [vmem:[#allocation2 + $0x1d8] sm:$0xff] }
  0x7e   :  { %v463_v51 = vcombine.high %v107_v49, %v107_v49  ;;  %v2482_v52 = vrot.slane %v107_v49, %v469_v47  ;;  %v173_v55 = vld [vmem:[#allocation2 + $0x208] sm:$0xff]  ;;  %v172_v59 = vld [vmem:[#allocation2 + $0x200] sm:$0xff]  ;;  %1752 = vmatpush1.bf16.msra.mxu1 %v1751_v43  ;;  %v1765_v34 = vpack.c.bf16 %v167_v28, %v159_v27  ;;  %v158_v35 = vld [vmem:[#allocation2 + $0x190] sm:$0xff] }
  0x7f   :  { %v181_v58 = vld [vmem:[#allocation2 + $0x248] sm:$0xff]  ;;  %1690 = vmatprep.subr.bf16.mxu0 %v1689_v44  ;;  %v180_v61 = vld [vmem:[#allocation2 + $0x240] sm:$0xff]  ;;  %1593 = vmatprep.subr.msk.mxu1 %vm484_vm0, %v413_v48  ;;  %v166_v36 = vld [vmem:[#allocation2 + $0x1d0] sm:$0xff] }
  0x80   :  { %v1693_v60 = vpack.c.bf16 %v181_v58, %v173_v55  ;;  %v412_v1 = vld [vmem:[#allocation2 + $0x980] sm:$0xf]  ;;  %v2485_v2 = vrot.slane %v463_v51, %v469_v47  ;;  %v189_v4 = vld [vmem:[#allocation2 + $0x288] sm:$0xff]  ;;  %v2489_v6 = vcombine.high %v2482_v52, %v2482_v52  ;;  %1692 = vmatpush1.bf16.msra.mxu0 %v1691_v56  ;;  %v1695_v8 = vpack.c.bf16 %v180_v61, %v172_v59  ;;  %v175_v40 = vld [vmem:[#allocation2 + $0x218] sm:$0xff] }
  0x81   :  { %v197_v5 = vld [vmem:[#allocation2 + $0x2c8] sm:$0xff]  ;;  %v188_v12 = vld [vmem:[#allocation2 + $0x280] sm:$0xff]  ;;  %v183_v41 = vld [vmem:[#allocation2 + $0x258] sm:$0xff]  ;;  %v1767_v44 = vpack.c.bf16 %v166_v36, %v158_v35 }
  0x82   :  { %573 = vmatprep.mubr.f32.mxu0 %v2489_v6  ;;  %1594 = vmatpush1.msk.msra.mxu1 %vm484_vm0, %v412_v1  ;;  %v1697_v13 = vpack.c.bf16 %v197_v5, %v189_v4  ;;  %v196_v14 = vld [vmem:[#allocation2 + $0x2c0] sm:$0xff]  ;;  %v205_v17 = vld [vmem:[#allocation2 + $0x308] sm:$0xff]  ;;  %v1769_v46 = vpack.c.bf16 %v183_v41, %v175_v40  ;;  %v174_v47 = vld [vmem:[#allocation2 + $0x210] sm:$0xff] }
  0x83   :  { %1694 = vmatprep.subr.bf16.mxu0 %v1693_v60  ;;  %1595 = vmatmul.mubr.msk.f32.vlgmr.msra.gmra.mrb[0].mxu1 %vm481_vm1, %v2485_v2  ;;  %v213_v18 = vld [vmem:[#allocation2 + $0x348] sm:$0xff]  ;;  %v1699_v20 = vpack.c.bf16 %v196_v14, %v188_v12  ;;  %v204_v24 = vld [vmem:[#allocation2 + $0x300] sm:$0xff]  ;;  %v182_v48 = vld [vmem:[#allocation2 + $0x250] sm:$0xff] }
  0x84   :  { %1754 = vmatprep.subr.bf16.mxu1 %v1753_v3  ;;  %715 = vmatprep.mubr.f32.mxu1 %v2489_v6  ;;  %v1701_v25 = vpack.c.bf16 %v213_v18, %v205_v17  ;;  %v212_v26 = vld [vmem:[#allocation2 + $0x340] sm:$0xff]  ;;  %v221_v30 = vld [vmem:[#allocation2 + $0x388] sm:$0xff]  ;;  %v191_v53 = vld [vmem:[#allocation2 + $0x298] sm:$0xff]  ;;  %v1771_v57 = vpack.c.bf16 %v182_v48, %v174_v47 }
  0x85   :  { %1756 = vmatpush1.bf16.msra.mxu1 %v1755_v7  ;;  %1696 = vmatpush1.bf16.msra.mxu0 %v1695_v8  ;;  %v229_v31 = vld [vmem:[#allocation2 + $0x3c8] sm:$0xff]  ;;  %v1703_v33 = vpack.c.bf16 %v212_v26, %v204_v24  ;;  %v220_v37 = vld [vmem:[#allocation2 + $0x380] sm:$0xff]  ;;  %v199_v54 = vld [vmem:[#allocation2 + $0x2d8] sm:$0xff] }
  0x86   :  { %1758 = vmatprep.subr.bf16.mxu1 %v1757_v9  ;;  %1698 = vmatprep.subr.bf16.mxu0 %v1697_v13  ;;  %v1705_v38 = vpack.c.bf16 %v229_v31, %v221_v30  ;;  %v228_v39 = vld [vmem:[#allocation2 + $0x3c0] sm:$0xff]  ;;  %v237_v42 = vld [vmem:[#allocation2 + $0x408] sm:$0xff]  ;;  %v1773_v59 = vpack.c.bf16 %v199_v54, %v191_v53  ;;  %v190_v60 = vld [vmem:[#allocation2 + $0x290] sm:$0xff] }
  0x87   :  { %v245_v43 = vld [vmem:[#allocation2 + $0x448] sm:$0xff]  ;;  %v1707_v45 = vpack.c.bf16 %v228_v39, %v220_v37  ;;  %v236_v49 = vld [vmem:[#allocation2 + $0x400] sm:$0xff]  ;;  %v198_v61 = vld [vmem:[#allocation2 + $0x2d0] sm:$0xff] }
  0x88   :  { %v1709_v50 = vpack.c.bf16 %v245_v43, %v237_v42  ;;  %v244_v51 = vld [vmem:[#allocation2 + $0x440] sm:$0xff]  ;;  %v253_v55 = vld [vmem:[#allocation2 + $0x488] sm:$0xff]  ;;  %v207_v3 = vld [vmem:[#allocation2 + $0x318] sm:$0xff]  ;;  %v1775_v8 = vpack.c.bf16 %v198_v61, %v190_v60 }
  0x89   :  { %1760 = vmatpush1.bf16.msra.mxu1 %v1759_v19  ;;  %1700 = vmatpush1.bf16.msra.mxu0 %v1699_v20  ;;  %v261_v56 = vld [vmem:[#allocation2 + $0x4c8] sm:$0xff]  ;;  %v1711_v58 = vpack.c.bf16 %v244_v51, %v236_v49  ;;  %v252_v62 = vld [vmem:[#allocation2 + $0x480] sm:$0xff]  ;;  %v215_v4 = vld [vmem:[#allocation2 + $0x358] sm:$0xff] }
  0x8a   :  { %1762 = vmatprep.subr.bf16.mxu1 %v1761_v21  ;;  %1702 = vmatprep.subr.bf16.mxu0 %v1701_v25  ;;  %v1713_v63 = vpack.c.bf16 %v261_v56, %v253_v55  ;;  %v260_v1 = vld [vmem:[#allocation2 + $0x4c0] sm:$0xff]  ;;  %v269_v5 = vld [vmem:[#allocation2 + $0x508] sm:$0xff]  ;;  %v1777_v10 = vpack.c.bf16 %v215_v4, %v207_v3  ;;  %v206_v11 = vld [vmem:[#allocation2 + $0x310] sm:$0xff] }
  0x8b   :  { %v277_v7 = vld [vmem:[#allocation2 + $0x548] sm:$0xff]  ;;  %v1715_v9 = vpack.c.bf16 %v260_v1, %v252_v62  ;;  %v214_v12 = vld [vmem:[#allocation2 + $0x350] sm:$0xff]  ;;  %v268_v13 = vld [vmem:[#allocation2 + $0x500] sm:$0xff] }
  0x8c   :  { %v1717_v14 = vpack.c.bf16 %v277_v7, %v269_v5  ;;  %v276_v15 = vld [vmem:[#allocation2 + $0x540] sm:$0xff]  ;;  %v223_v16 = vld [vmem:[#allocation2 + $0x398] sm:$0xff]  ;;  %v285_v18 = vld [vmem:[#allocation2 + $0x588] sm:$0xff]  ;;  %v1779_v20 = vpack.c.bf16 %v214_v12, %v206_v11 }
  0x8d   :  { %1764 = vmatpush1.bf16.msra.mxu1 %v1763_v32  ;;  %1704 = vmatpush1.bf16.msra.mxu0 %v1703_v33  ;;  %v231_v17 = vld [vmem:[#allocation2 + $0x3d8] sm:$0xff]  ;;  %v293_v19 = vld [vmem:[#allocation2 + $0x5c8] sm:$0xff]  ;;  %v1719_v21 = vpack.c.bf16 %v276_v15, %v268_v13  ;;  %v222_v23 = vld [vmem:[#allocation2 + $0x390] sm:$0xff] }
  0x8e   :  { %1766 = vmatprep.subr.bf16.mxu1 %v1765_v34  ;;  %1706 = vmatprep.subr.bf16.mxu0 %v1705_v38  ;;  %v1781_v22 = vpack.c.bf16 %v231_v17, %v223_v16  ;;  %v230_v24 = vld [vmem:[#allocation2 + $0x3d0] sm:$0xff]  ;;  %v284_v25 = vld [vmem:[#allocation2 + $0x580] sm:$0xff]  ;;  %v1721_v26 = vpack.c.bf16 %v293_v19, %v285_v18  ;;  %v239_v28 = vld [vmem:[#allocation2 + $0x418] sm:$0xff] }
  0x8f   :  { %v292_v27 = vld [vmem:[#allocation2 + $0x5c0] sm:$0xff]  ;;  %v247_v30 = vld [vmem:[#allocation2 + $0x458] sm:$0xff]  ;;  %v301_v31 = vld [vmem:[#allocation2 + $0x608] sm:$0xff]  ;;  %v1783_v33 = vpack.c.bf16 %v230_v24, %v222_v23 }
  0x90   :  { %v309_v32 = vld [vmem:[#allocation2 + $0x648] sm:$0xff]  ;;  %v1723_v34 = vpack.c.bf16 %v292_v27, %v284_v25  ;;  %v1785_v35 = vpack.c.bf16 %v247_v30, %v239_v28  ;;  %v238_v36 = vld [vmem:[#allocation2 + $0x410] sm:$0xff]  ;;  %v300_v38 = vld [vmem:[#allocation2 + $0x600] sm:$0xff] }
  0x91   :  { %1768 = vmatpush1.bf16.msra.mxu1 %v1767_v44  ;;  %1708 = vmatpush1.bf16.msra.mxu0 %v1707_v45  ;;  %v246_v37 = vld [vmem:[#allocation2 + $0x450] sm:$0xff]  ;;  %v1725_v39 = vpack.c.bf16 %v309_v32, %v301_v31  ;;  %v308_v40 = vld [vmem:[#allocation2 + $0x640] sm:$0xff]  ;;  %v255_v41 = vld [vmem:[#allocation2 + $0x498] sm:$0xff] }
  0x92   :  { %1770 = vmatprep.subr.bf16.mxu1 %v1769_v46  ;;  %1710 = vmatprep.subr.bf16.mxu0 %v1709_v50  ;;  %v263_v42 = vld [vmem:[#allocation2 + $0x4d8] sm:$0xff]  ;;  %v317_v43 = vld [vmem:[#allocation2 + $0x688] sm:$0xff]  ;;  %v1787_v45 = vpack.c.bf16 %v246_v37, %v238_v36  ;;  %v1727_v46 = vpack.c.bf16 %v308_v40, %v300_v38  ;;  %v254_v48 = vld [vmem:[#allocation2 + $0x490] sm:$0xff] }
  0x93   :  { %v325_v44 = vld [vmem:[#allocation2 + $0x6c8] sm:$0xff]  ;;  %v1789_v47 = vpack.c.bf16 %v263_v42, %v255_v41  ;;  %v262_v49 = vld [vmem:[#allocation2 + $0x4d0] sm:$0xff]  ;;  %v316_v50 = vld [vmem:[#allocation2 + $0x680] sm:$0xff] }
  0x94   :  { %v1729_v51 = vpack.c.bf16 %v325_v44, %v317_v43  ;;  %v324_v53 = vld [vmem:[#allocation2 + $0x6c0] sm:$0xff]  ;;  %v271_v54 = vld [vmem:[#allocation2 + $0x518] sm:$0xff]  ;;  %v333_v56 = vld [vmem:[#allocation2 + $0x708] sm:$0xff] }
  0x95   :  { %1772 = vmatpush1.bf16.msra.mxu1 %v1771_v57  ;;  %1712 = vmatpush1.bf16.msra.mxu0 %v1711_v58  ;;  %v279_v55 = vld [vmem:[#allocation2 + $0x558] sm:$0xff]  ;;  %v341_v57 = vld [vmem:[#allocation2 + $0x748] sm:$0xff]  ;;  %v1791_v58 = vpack.c.bf16 %v262_v49, %v254_v48  ;;  %v270_v61 = vld [vmem:[#allocation2 + $0x510] sm:$0xff] }
  0x96   :  { %1774 = vmatprep.subr.bf16.mxu1 %v1773_v59  ;;  %1714 = vmatprep.subr.bf16.mxu0 %v1713_v63  ;;  %v1731_v59 = vpack.c.bf16 %v324_v53, %v316_v50  ;;  %v1793_v60 = vpack.c.bf16 %v279_v55, %v271_v54  ;;  %v278_v62 = vld [vmem:[#allocation2 + $0x550] sm:$0xff]  ;;  %v332_v63 = vld [vmem:[#allocation2 + $0x700] sm:$0xff]  ;;  %v1733_v1 = vpack.c.bf16 %v341_v57, %v333_v56  ;;  %v287_v4 = vld [vmem:[#allocation2 + $0x598] sm:$0xff] }
  0x97   :  { %v340_v3 = vld [vmem:[#allocation2 + $0x740] sm:$0xff]  ;;  %v295_v5 = vld [vmem:[#allocation2 + $0x5d8] sm:$0xff]  ;;  %v349_v7 = vld [vmem:[#allocation2 + $0x788] sm:$0xff] }
  0x98   :  { %v1797_v11 = vpack.c.bf16 %v295_v5, %v287_v4  ;;  %v286_v12 = vld [vmem:[#allocation2 + $0x590] sm:$0xff]  ;;  %v356_v16 = vld [vmem:[#allocation2 + $0x7c0] sm:$0xff]  ;;  %v303_v17 = vld [vmem:[#allocation2 + $0x618] sm:$0xff] }
  0x99   :  { %1776 = vmatpush1.bf16.msra.mxu1 %v1775_v8  ;;  %1716 = vmatpush1.bf16.msra.mxu0 %v1715_v9  ;;  %v357_v8 = vld [vmem:[#allocation2 + $0x7c8] sm:$0xff]  ;;  %v1795_v9 = vpack.c.bf16 %v278_v62, %v270_v61  ;;  %v294_v13 = vld [vmem:[#allocation2 + $0x5d0] sm:$0xff]  ;;  %v311_v18 = vld [vmem:[#allocation2 + $0x658] sm:$0xff] }
  0x9a   :  { %1778 = vmatprep.subr.bf16.mxu1 %v1777_v10  ;;  %1718 = vmatprep.subr.bf16.mxu0 %v1717_v14  ;;  %v1735_v10 = vpack.c.bf16 %v340_v3, %v332_v63  ;;  %v348_v14 = vld [vmem:[#allocation2 + $0x780] sm:$0xff]  ;;  %v1737_v15 = vpack.c.bf16 %v357_v8, %v349_v7  ;;  %v113_v19 = vld [vmem:[#allocation2 + $0x28] sm:$0xff]  ;;  %v1801_v23 = vpack.c.bf16 %v311_v18, %v303_v17  ;;  %v302_v24 = vld [vmem:[#allocation2 + $0x610] sm:$0xff] }
  0x9b   :  { %v310_v25 = vld [vmem:[#allocation2 + $0x650] sm:$0xff]  ;;  %v327_v27 = vld [vmem:[#allocation2 + $0x6d8] sm:$0xff]  ;;  %v112_v30 = vld [vmem:[#allocation2 + $0x20] sm:$0xff] }
  0x9c   :  { %v120_v31 = vld [vmem:[#allocation2 + $0x60] sm:$0xff]  ;;  %v129_v32 = vld [vmem:[#allocation2 + $0xa8] sm:$0xff]  ;;  %v318_v36 = vld [vmem:[#allocation2 + $0x690] sm:$0xff] }
  0x9d   :  { %1780 = vmatpush1.bf16.msra.mxu1 %v1779_v20  ;;  %1720 = vmatpush1.bf16.msra.mxu0 %v1719_v21  ;;  %v121_v20 = vld [vmem:[#allocation2 + $0x68] sm:$0xff]  ;;  %v1799_v21 = vpack.c.bf16 %v294_v13, %v286_v12  ;;  %v326_v37 = vld [vmem:[#allocation2 + $0x6d0] sm:$0xff]  ;;  %v335_v38 = vld [vmem:[#allocation2 + $0x718] sm:$0xff] }
  0x9e   :  { %1782 = vmatprep.subr.bf16.mxu1 %v1781_v22  ;;  %1722 = vmatprep.subr.bf16.mxu0 %v1721_v26  ;;  %v1739_v22 = vpack.c.bf16 %v356_v16, %v348_v14  ;;  %v319_v26 = vld [vmem:[#allocation2 + $0x698] sm:$0xff]  ;;  %v1829_v28 = vpack.c.bf16 %v121_v20, %v113_v19  ;;  %v128_v42 = vld [vmem:[#allocation2 + $0xa0] sm:$0xff]  ;;  %v145_v44 = vld [vmem:[#allocation2 + $0x128] sm:$0xff] }
  0x9f   :  { %v343_v40 = vld [vmem:[#allocation2 + $0x758] sm:$0xff]  ;;  %v136_v43 = vld [vmem:[#allocation2 + $0xe0] sm:$0xff]  ;;  %v334_v48 = vld [vmem:[#allocation2 + $0x710] sm:$0xff] }
  0xa0   :  { %v342_v49 = vld [vmem:[#allocation2 + $0x750] sm:$0xff]  ;;  %v351_v50 = vld [vmem:[#allocation2 + $0x798] sm:$0xff]  ;;  %v144_v55 = vld [vmem:[#allocation2 + $0x120] sm:$0xff] }
  0xa1   :  { %1784 = vmatpush1.bf16.msra.mxu1 %v1783_v33  ;;  %1724 = vmatpush1.bf16.msra.mxu0 %v1723_v34  ;;  %v137_v33 = vld [vmem:[#allocation2 + $0xe8] sm:$0xff]  ;;  %v1803_v34 = vpack.c.bf16 %v310_v25, %v302_v24  ;;  %v359_v53 = vld [vmem:[#allocation2 + $0x7d8] sm:$0xff]  ;;  %v152_v56 = vld [vmem:[#allocation2 + $0x160] sm:$0xff] }
  0xa2   :  { %1786 = vmatprep.subr.bf16.mxu1 %v1785_v35  ;;  %1726 = vmatprep.subr.bf16.mxu0 %v1725_v39  ;;  %v1805_v35 = vpack.c.bf16 %v327_v27, %v319_v26  ;;  %v1831_v39 = vpack.c.bf16 %v120_v31, %v112_v30  ;;  %v1833_v41 = vpack.c.bf16 %v137_v33, %v129_v32  ;;  %v161_v57 = vld [vmem:[#allocation2 + $0x1a8] sm:$0xff]  ;;  %v350_v61 = vld [vmem:[#allocation2 + $0x790] sm:$0xff]  ;;  %v367_v63 = vld [vmem:[#allocation2 + $0x818] sm:$0xff] }
  0xa3   :  { %v358_v62 = vld [vmem:[#allocation2 + $0x7d0] sm:$0xff]  ;;  %v375_v3 = vld [vmem:[#allocation2 + $0x858] sm:$0xff]  ;;  %v160_v5 = vld [vmem:[#allocation2 + $0x1a0] sm:$0xff] }
  0xa4   :  { %v168_v7 = vld [vmem:[#allocation2 + $0x1e0] sm:$0xff]  ;;  %v177_v8 = vld [vmem:[#allocation2 + $0x228] sm:$0xff]  ;;  %v366_v12 = vld [vmem:[#allocation2 + $0x810] sm:$0xff] }
  0xa5   :  { %1788 = vmatpush1.bf16.msra.mxu1 %v1787_v45  ;;  %1728 = vmatpush1.bf16.msra.mxu0 %v1727_v46  ;;  %v153_v45 = vld [vmem:[#allocation2 + $0x168] sm:$0xff]  ;;  %v1807_v46 = vpack.c.bf16 %v326_v37, %v318_v36  ;;  %v374_v13 = vld [vmem:[#allocation2 + $0x850] sm:$0xff]  ;;  %v383_v14 = vld [vmem:[#allocation2 + $0x898] sm:$0xff] }
  0xa6   :  { %1790 = vmatprep.subr.bf16.mxu1 %v1789_v47  ;;  %1730 = vmatprep.subr.bf16.mxu0 %v1729_v51  ;;  %v1809_v47 = vpack.c.bf16 %v343_v40, %v335_v38  ;;  %v1835_v51 = vpack.c.bf16 %v136_v43, %v128_v42  ;;  %v1837_v54 = vpack.c.bf16 %v153_v45, %v145_v44  ;;  %v391_v16 = vld [vmem:[#allocation2 + $0x8d8] sm:$0xff]  ;;  %v176_v18 = vld [vmem:[#allocation2 + $0x220] sm:$0xff]  ;;  %v193_v20 = vld [vmem:[#allocation2 + $0x2a8] sm:$0xff] }
  0xa7   :  { %v184_v19 = vld [vmem:[#allocation2 + $0x260] sm:$0xff]  ;;  %v382_v24 = vld [vmem:[#allocation2 + $0x890] sm:$0xff]  ;;  %v399_v26 = vld [vmem:[#allocation2 + $0x918] sm:$0xff] }
  0xa8   :  { %v390_v25 = vld [vmem:[#allocation2 + $0x8d0] sm:$0xff]  ;;  %v1847_v27 = vpack.c.bf16 %v184_v19, %v176_v18  ;;  %v192_v31 = vld [vmem:[#allocation2 + $0x2a0] sm:$0xff]  ;;  %v209_v33 = vld [vmem:[#allocation2 + $0x328] sm:$0xff] }
  0xa9   :  { %1792 = vmatpush1.bf16.msra.mxu1 %v1791_v58  ;;  %1732 = vmatpush1.bf16.msra.mxu0 %v1731_v59  ;;  %v169_v58 = vld [vmem:[#allocation2 + $0x1e8] sm:$0xff]  ;;  %v1811_v59 = vpack.c.bf16 %v342_v49, %v334_v48  ;;  %v200_v32 = vld [vmem:[#allocation2 + $0x2e0] sm:$0xff]  ;;  %v398_v37 = vld [vmem:[#allocation2 + $0x910] sm:$0xff] }
  0xaa   :  { %1794 = vmatprep.subr.bf16.mxu1 %v1793_v60  ;;  %1734 = vmatprep.subr.bf16.mxu0 %v1733_v1  ;;  %v1813_v60 = vpack.c.bf16 %v359_v53, %v351_v50  ;;  %v1839_v1 = vpack.c.bf16 %v152_v56, %v144_v55  ;;  %v1841_v4 = vpack.c.bf16 %v169_v58, %v161_v57  ;;  %v406_v38 = vld [vmem:[#allocation2 + $0x950] sm:$0xff]  ;;  %v216_v42 = vld [vmem:[#allocation2 + $0x360] sm:$0xff]  ;;  %v225_v43 = vld [vmem:[#allocation2 + $0x3a8] sm:$0xff] }
  0xab   :  { %v233_v44 = vld [vmem:[#allocation2 + $0x3e8] sm:$0xff]  ;;  %v1827_v45 = vpack.c.bf16 %v406_v38, %v398_v37  ;;  %v123_v49 = vld [vmem:[#allocation2 + $0x78] sm:$0xff]  ;;  %v114_v50 = vld [vmem:[#allocation2 + $0x30] sm:$0xff] }
  0xac   :  { %v1857_v53 = vpack.c.bf16 %v233_v44, %v225_v43  ;;  %v224_v55 = vld [vmem:[#allocation2 + $0x3a0] sm:$0xff]  ;;  %v139_v57 = vld [vmem:[#allocation2 + $0xf8] sm:$0xff]  ;;  %v241_v58 = vld [vmem:[#allocation2 + $0x428] sm:$0xff] }
  0xad   :  { %1796 = vmatpush1.bf16.msra.mxu1 %v1795_v9  ;;  %1736 = vmatpush1.bf16.msra.mxu0 %v1735_v10  ;;  %v185_v9 = vld [vmem:[#allocation2 + $0x268] sm:$0xff]  ;;  %v1815_v10 = vpack.c.bf16 %v358_v62, %v350_v61  ;;  %v232_v56 = vld [vmem:[#allocation2 + $0x3e0] sm:$0xff]  ;;  %v163_v18 = vld [vmem:[#allocation2 + $0x1b8] sm:$0xff] }
  0xae   :  { %1798 = vmatprep.subr.bf16.mxu1 %v1797_v11  ;;  %1738 = vmatprep.subr.bf16.mxu0 %v1737_v15  ;;  %v1817_v11 = vpack.c.bf16 %v375_v3, %v367_v63  ;;  %v1843_v15 = vpack.c.bf16 %v168_v7, %v160_v5  ;;  %v1845_v17 = vpack.c.bf16 %v185_v9, %v177_v8  ;;  %v130_v63 = vld [vmem:[#allocation2 + $0xb0] sm:$0xff]  ;;  %v147_v5 = vld [vmem:[#allocation2 + $0x138] sm:$0xff]  ;;  %v240_v8 = vld [vmem:[#allocation2 + $0x420] sm:$0xff] }
  0xaf   :  { %v1859_v3 = vpack.c.bf16 %v232_v56, %v224_v55  ;;  %v248_v9 = vld [vmem:[#allocation2 + $0x460] sm:$0xff]  ;;  %v297_v37 = vld [vmem:[#allocation2 + $0x5e8] sm:$0xff]  ;;  %v211_v55 = vld [vmem:[#allocation2 + $0x338] sm:$0xff] }
  0xb0   :  { %v288_v44 = vld [vmem:[#allocation2 + $0x5a0] sm:$0xff]  ;;  %vm2138_vm5 = vmpackc.low %vm1499_vm3, %vm2351_vm4 }
  0xb1   :  { %1800 = vmatpush1.bf16.msra.mxu1 %v1799_v21  ;;  %1740 = vmatpush1.bf16.msra.mxu0 %v1739_v22  ;;  %v201_v21 = vld [vmem:[#allocation2 + $0x2e8] sm:$0xff]  ;;  %v1819_v22 = vpack.c.bf16 %v374_v13, %v366_v12 }
  0xb2   :  { %1802 = vmatprep.subr.bf16.mxu1 %v1801_v23  ;;  %1830 = vmatprep.subr.bf16.mxu0 %v1829_v28  ;;  %v1821_v23 = vpack.c.bf16 %v391_v16, %v383_v14  ;;  %v407_v28 = vld [vmem:[#allocation2 + $0x958] sm:$0xff]  ;;  %v1849_v30 = vpack.c.bf16 %v201_v21, %v193_v20  ;;  %v265_v12 = vld [vmem:[#allocation2 + $0x4e8] sm:$0xff]  ;;  %v146_v14 = vld [vmem:[#allocation2 + $0x130] sm:$0xff]  ;;  %v1863_v16 = vpack.c.bf16 %v248_v9, %v240_v8 }
  0xb3   :  { %v1825_v36 = vpack.c.bf16 %v407_v28, %v399_v26  ;;  %v256_v20 = vld [vmem:[#allocation2 + $0x4a0] sm:$0xff]  ;;  %v162_v26 = vld [vmem:[#allocation2 + $0x1b0] sm:$0xff] }
  0xb4   :  { %574 = vmatmul.mubr.f32.vlgmr.msra.gmra.mrb[0].mxu0 %v2482_v52  ;;  %v264_v21 = vld [vmem:[#allocation2 + $0x4e0] sm:$0xff] }
  0xb5   :  { %1804 = vmatpush1.bf16.msra.mxu1 %v1803_v34  ;;  %1832 = vmatpush1.bf16.msra.mxu0 %v1831_v39  ;;  %v217_v34 = vld [vmem:[#allocation2 + $0x368] sm:$0xff]  ;;  %v1851_v39 = vpack.c.bf16 %v200_v32, %v192_v31  ;;  %v1867_v28 = vpack.c.bf16 %v264_v21, %v256_v20  ;;  %v179_v31 = vld [vmem:[#allocation2 + $0x238] sm:$0xff]  ;;  %v320_v8 = vld [vmem:[#allocation2 + $0x6a0] sm:$0xff] }
  0xb6   :  { %1806 = vmatprep.subr.bf16.mxu1 %v1805_v35  ;;  %1834 = vmatprep.subr.bf16.mxu0 %v1833_v41  ;;  %v1823_v35 = vpack.c.bf16 %v390_v25, %v382_v24  ;;  %v1853_v40 = vpack.c.bf16 %v217_v34, %v209_v33  ;;  %v208_v41 = vld [vmem:[#allocation2 + $0x320] sm:$0xff]  ;;  %v281_v24 = vld [vmem:[#allocation2 + $0x568] sm:$0xff] }
  0xb7   :  { %857 = vmatprep.mubr.f32.mxu0 %v2489_v6  ;;  %v1855_v48 = vpack.c.bf16 %v216_v42, %v208_v41  ;;  %v272_v33 = vld [vmem:[#allocation2 + $0x520] sm:$0xff]  ;;  %v195_v42 = vld [vmem:[#allocation2 + $0x2b8] sm:$0xff] }
  0xb8   :  { %v280_v34 = vld [vmem:[#allocation2 + $0x560] sm:$0xff] }
  0xb9   :  { %1808 = vmatpush1.bf16.msra.mxu1 %v1807_v46  ;;  %1836 = vmatpush1.bf16.msra.mxu0 %v1835_v51  ;;  %v415_v46 = vld [vmem:[#allocation2 + $0x998] sm:$0xf]  ;;  %v122_v51 = vld [vmem:[#allocation2 + $0x70] sm:$0xff]  ;;  %v328_v9 = vld [vmem:[#allocation2 + $0x6e0] sm:$0xff] }
  0xba   :  { %1810 = vmatprep.subr.bf16.mxu1 %v1809_v47  ;;  %1838 = vmatprep.subr.bf16.mxu0 %v1837_v54  ;;  %v115_v47 = vld [vmem:[#allocation2 + $0x38] sm:$0xff]  ;;  %v1907_v62 = vpack.c.bf16 %v122_v51, %v114_v50  ;;  %v194_v50 = vld [vmem:[#allocation2 + $0x2b0] sm:$0xff]  ;;  %v336_v20 = vld [vmem:[#allocation2 + $0x720] sm:$0xff] }
  0xbb   :  { %v131_v54 = vld [vmem:[#allocation2 + $0xb8] sm:$0xff]  ;;  %v1905_v61 = vpack.c.bf16 %v123_v49, %v115_v47  ;;  %v305_v47 = vld [vmem:[#allocation2 + $0x628] sm:$0xff]  ;;  %v202_v51 = vld [vmem:[#allocation2 + $0x2f0] sm:$0xff] }
  0xbc   :  { %v344_v21 = vld [vmem:[#allocation2 + $0x760] sm:$0xff] }
  0xbd   :  { %1812 = vmatpush1.bf16.msra.mxu1 %v1811_v59  ;;  %1840 = vmatpush1.bf16.msra.mxu0 %v1839_v1  ;;  %v249_v59 = vld [vmem:[#allocation2 + $0x468] sm:$0xff]  ;;  %v138_v1 = vld [vmem:[#allocation2 + $0xf0] sm:$0xff] }
  0xbe   :  { %1814 = vmatprep.subr.bf16.mxu1 %v1813_v60  ;;  %1842 = vmatprep.subr.bf16.mxu0 %v1841_v4  ;;  %v414_v60 = vld [vmem:[#allocation2 + $0x990] sm:$0xf]  ;;  %v1909_v4 = vpack.c.bf16 %v139_v57, %v131_v54  ;;  %v1861_v7 = vpack.c.bf16 %v249_v59, %v241_v58  ;;  %v1911_v13 = vpack.c.bf16 %v138_v1, %v130_v63  ;;  %v304_v57 = vld [vmem:[#allocation2 + $0x620] sm:$0xff]  ;;  %v219_v59 = vld [vmem:[#allocation2 + $0x378] sm:$0xff] }
  0xbf   :  { %v312_v58 = vld [vmem:[#allocation2 + $0x660] sm:$0xff]  ;;  %v210_v63 = vld [vmem:[#allocation2 + $0x330] sm:$0xff] }
  0xc0   :  { %v218_v1 = vld [vmem:[#allocation2 + $0x370] sm:$0xff] }
  0xc1   :  { %1816 = vmatpush1.bf16.msra.mxu1 %v1815_v10  ;;  %1844 = vmatpush1.bf16.msra.mxu0 %v1843_v15  ;;  %v155_v10 = vld [vmem:[#allocation2 + $0x178] sm:$0xff]  ;;  %v154_v15 = vld [vmem:[#allocation2 + $0x170] sm:$0xff] }
  0xc2   :  { %1818 = vmatprep.subr.bf16.mxu1 %v1817_v11  ;;  %1846 = vmatprep.subr.bf16.mxu0 %v1845_v17  ;;  %v257_v11 = vld [vmem:[#allocation2 + $0x4a8] sm:$0xff]  ;;  %v1913_v17 = vpack.c.bf16 %v155_v10, %v147_v5  ;;  %v1915_v25 = vpack.c.bf16 %v154_v15, %v146_v14  ;;  %v227_v5 = vld [vmem:[#allocation2 + $0x3b8] sm:$0xff]  ;;  %v226_v14 = vld [vmem:[#allocation2 + $0x3b0] sm:$0xff] }
  0xc3   :  { %v1865_v19 = vpack.c.bf16 %v265_v12, %v257_v11  ;;  %v235_v10 = vld [vmem:[#allocation2 + $0x3f8] sm:$0xff]  ;;  %v337_v11 = vld [vmem:[#allocation2 + $0x728] sm:$0xff]  ;;  %v234_v15 = vld [vmem:[#allocation2 + $0x3f0] sm:$0xff] }
  0xc4   :  { %716 = vmatmul.mubr.f32.vlgmr.msra.gmra.mrb[2].mxu1 %v2482_v52  ;;  %v345_v12 = vld [vmem:[#allocation2 + $0x768] sm:$0xff] }
  0xc5   :  { %1820 = vmatpush1.bf16.msra.mxu1 %v1819_v22  ;;  %786 = vmatprep.mubr.f32.mxu1 %v2347_v0  ;;  %v171_v22 = vld [vmem:[#allocation2 + $0x1f8] sm:$0xff] }
  0xc6   :  { %1822 = vmatprep.subr.bf16.mxu1 %v1821_v23  ;;  %1848 = vmatpush1.bf16.msra.mxu0 %v1847_v27  ;;  %v273_v23 = vld [vmem:[#allocation2 + $0x528] sm:$0xff]  ;;  %v170_v27 = vld [vmem:[#allocation2 + $0x1f0] sm:$0xff] }
  0xc7   :  { %1850 = vmatprep.subr.bf16.mxu0 %v1849_v30  ;;  %v1917_v30 = vpack.c.bf16 %v171_v22, %v163_v18  ;;  %v1869_v32 = vpack.c.bf16 %v281_v24, %v273_v23  ;;  %v1919_v38 = vpack.c.bf16 %v170_v27, %v162_v26  ;;  %v243_v18 = vld [vmem:[#allocation2 + $0x438] sm:$0xff]  ;;  %v353_v23 = vld [vmem:[#allocation2 + $0x7a8] sm:$0xff]  ;;  %v242_v26 = vld [vmem:[#allocation2 + $0x430] sm:$0xff] }
  0xc8   :  { %v251_v22 = vld [vmem:[#allocation2 + $0x478] sm:$0xff]  ;;  %v361_v24 = vld [vmem:[#allocation2 + $0x7e8] sm:$0xff]  ;;  %v250_v27 = vld [vmem:[#allocation2 + $0x470] sm:$0xff] }
  0xc9   :  { %1824 = vmatpush1.bf16.msra.mxu1 %v1823_v35  ;;  %v187_v35 = vld [vmem:[#allocation2 + $0x278] sm:$0xff] }
  0xca   :  { %1826 = vmatprep.subr.bf16.mxu1 %v1825_v36  ;;  %1852 = vmatpush1.bf16.msra.mxu0 %v1851_v39  ;;  %v289_v36 = vld [vmem:[#allocation2 + $0x5a8] sm:$0xff]  ;;  %v178_v39 = vld [vmem:[#allocation2 + $0x230] sm:$0xff]  ;;  %v1921_v41 = vpack.c.bf16 %v187_v35, %v179_v31  ;;  %v259_v31 = vld [vmem:[#allocation2 + $0x4b8] sm:$0xff] }
  0xcb   :  { %1854 = vmatprep.subr.bf16.mxu0 %v1853_v40  ;;  %v1871_v40 = vpack.c.bf16 %v280_v34, %v272_v33  ;;  %v1873_v43 = vpack.c.bf16 %v297_v37, %v289_v36  ;;  %v352_v33 = vld [vmem:[#allocation2 + $0x7a0] sm:$0xff]  ;;  %v267_v35 = vld [vmem:[#allocation2 + $0x4f8] sm:$0xff]  ;;  %v369_v36 = vld [vmem:[#allocation2 + $0x828] sm:$0xff] }
  0xcc   :  { %v360_v34 = vld [vmem:[#allocation2 + $0x7e0] sm:$0xff]  ;;  %v377_v37 = vld [vmem:[#allocation2 + $0x868] sm:$0xff] }
  0xcd   :  { %1828 = vmatpush1.bf16.msra.mxu1 %v1827_v45  ;;  %v296_v45 = vld [vmem:[#allocation2 + $0x5e0] sm:$0xff] }
  0xce   :  { %1596 = vmatprep.subr.msk.mxu1 %vm484_vm0, %v415_v46  ;;  %1856 = vmatpush1.bf16.msra.mxu0 %v1855_v48  ;;  %v203_v46 = vld [vmem:[#allocation2 + $0x2f8] sm:$0xff]  ;;  %v313_v48 = vld [vmem:[#allocation2 + $0x668] sm:$0xff] }
  0xcf   :  { %1858 = vmatprep.subr.bf16.mxu0 %v1857_v53  ;;  %v1875_v53 = vpack.c.bf16 %v296_v45, %v288_v44  ;;  %v1925_v54 = vpack.c.bf16 %v203_v46, %v195_v42  ;;  %v1877_v56 = vpack.c.bf16 %v313_v48, %v305_v47  ;;  %v275_v42 = vld [vmem:[#allocation2 + $0x538] sm:$0xff]  ;;  %v368_v44 = vld [vmem:[#allocation2 + $0x820] sm:$0xff]  ;;  %v385_v47 = vld [vmem:[#allocation2 + $0x8a8] sm:$0xff] }
  0xd0   :  { %v376_v45 = vld [vmem:[#allocation2 + $0x860] sm:$0xff]  ;;  %v283_v46 = vld [vmem:[#allocation2 + $0x578] sm:$0xff]  ;;  %v393_v48 = vld [vmem:[#allocation2 + $0x8e8] sm:$0xff] }
  0xd1   :  { %1597 = vmatpush1.msk.msra.mxu1 %vm484_vm0, %v414_v60  ;;  %v321_v60 = vld [vmem:[#allocation2 + $0x6a8] sm:$0xff] }
  0xd2   :  { %1598 = vmatmul.mubr.msk.f32.vlgmr.msra.gmra.mrb[2].mxu1 %vm481_vm1, %v2485_v2  ;;  %1906 = vmatprep.subr.bf16.mxu1 %v1905_v61  ;;  %v329_v61 = vld [vmem:[#allocation2 + $0x6e8] sm:$0xff] }
  0xd3   :  { %1908 = vmatpush1.bf16.msra.mxu1 %v1907_v62  ;;  %1860 = vmatpush1.bf16.msra.mxu0 %v1859_v3  ;;  %v1927_v62 = vpack.c.bf16 %v202_v51, %v194_v50  ;;  %v1879_v3 = vpack.c.bf16 %v312_v58, %v304_v57  ;;  %v274_v50 = vld [vmem:[#allocation2 + $0x530] sm:$0xff]  ;;  %v384_v57 = vld [vmem:[#allocation2 + $0x8a0] sm:$0xff] }
  0xd4   :  { %1910 = vmatprep.subr.bf16.mxu1 %v1909_v4  ;;  %1862 = vmatprep.subr.bf16.mxu0 %v1861_v7  ;;  %v1929_v4 = vpack.c.bf16 %v219_v59, %v211_v55  ;;  %v1881_v7 = vpack.c.bf16 %v329_v61, %v321_v60  ;;  %v282_v51 = vld [vmem:[#allocation2 + $0x570] sm:$0xff]  ;;  %v291_v55 = vld [vmem:[#allocation2 + $0x5b8] sm:$0xff]  ;;  %v392_v58 = vld [vmem:[#allocation2 + $0x8e0] sm:$0xff] }
  0xd5   :  { %999 = vmatprep.mubr.f32.mxu1 %v2489_v6  ;;  %v186_v6 = vld [vmem:[#allocation2 + $0x270] sm:$0xff]  ;;  %v299_v59 = vld [vmem:[#allocation2 + $0x5f8] sm:$0xff]  ;;  %v401_v60 = vld [vmem:[#allocation2 + $0x928] sm:$0xff] }
  0xd6   :  { %v1923_v49 = vpack.c.bf16 %v186_v6, %v178_v39  ;;  %v258_v39 = vld [vmem:[#allocation2 + $0x4b0] sm:$0xff]  ;;  %v409_v61 = vld [vmem:[#allocation2 + $0x968] sm:$0xff] }
  0xd7   :  { %1912 = vmatpush1.bf16.msra.mxu1 %v1911_v13  ;;  %1864 = vmatpush1.bf16.msra.mxu0 %v1863_v16  ;;  %v1931_v13 = vpack.c.bf16 %v218_v1, %v210_v63  ;;  %v1883_v16 = vpack.c.bf16 %v328_v9, %v320_v8  ;;  %v266_v6 = vld [vmem:[#allocation2 + $0x4f0] sm:$0xff]  ;;  %v1899_v1 = vpack.c.bf16 %v392_v58, %v384_v57  ;;  %v408_v8 = vld [vmem:[#allocation2 + $0x960] sm:$0xff]  ;;  %v307_v9 = vld [vmem:[#allocation2 + $0x638] sm:$0xff] }
  0xd8   :  { %1914 = vmatprep.subr.bf16.mxu1 %v1913_v17  ;;  %1866 = vmatprep.subr.bf16.mxu0 %v1865_v19  ;;  %v1933_v17 = vpack.c.bf16 %v235_v10, %v227_v5  ;;  %v1885_v19 = vpack.c.bf16 %v345_v12, %v337_v11  ;;  %v290_v63 = vld [vmem:[#allocation2 + $0x5b0] sm:$0xff]  ;;  %v1901_v5 = vpack.c.bf16 %v409_v61, %v401_v60  ;;  %v315_v10 = vld [vmem:[#allocation2 + $0x678] sm:$0xff]  ;;  %v1098_v61 = vld [vmem:[#allocation7 + $0x38] sm:$0xff] }
  0xd9   :  { %v418_v57 = vld [vmem:[#allocation2 + $0x9b0] sm:$0xf] }
  0xda   :  { %v1096_v58 = vld [vmem:[#allocation7 + $0x28] sm:$0xff] }
  0xdb   :  { %1916 = vmatpush1.bf16.msra.mxu1 %v1915_v25  ;;  %1868 = vmatpush1.bf16.msra.mxu0 %v1867_v28  ;;  %v1935_v25 = vpack.c.bf16 %v234_v15, %v226_v14  ;;  %v1887_v28 = vpack.c.bf16 %v344_v21, %v336_v20  ;;  %v306_v14 = vld [vmem:[#allocation2 + $0x630] sm:$0xff] }
  0xdc   :  { %1918 = vmatprep.subr.bf16.mxu1 %v1917_v30  ;;  %1870 = vmatprep.subr.bf16.mxu0 %v1869_v32  ;;  %v1937_v30 = vpack.c.bf16 %v251_v22, %v243_v18  ;;  %v1889_v32 = vpack.c.bf16 %v361_v24, %v353_v23  ;;  %v314_v15 = vld [vmem:[#allocation2 + $0x670] sm:$0xff]  ;;  %v417_v18 = vld [vmem:[#allocation2 + $0x9a8] sm:$0xf]  ;;  %v416_v23 = vld [vmem:[#allocation2 + $0x9a0] sm:$0xf] }
  0xdd   :  { %v322_v21 = vld [vmem:[#allocation2 + $0x6b0] sm:$0xff]  ;;  %v339_v24 = vld [vmem:[#allocation2 + $0x738] sm:$0xff] }
  0xde   :  { %v330_v22 = vld [vmem:[#allocation2 + $0x6f0] sm:$0xff] }
  0xdf   :  { %1920 = vmatpush1.bf16.msra.mxu1 %v1919_v38  ;;  %1872 = vmatpush1.bf16.msra.mxu0 %v1871_v40  ;;  %v1939_v38 = vpack.c.bf16 %v250_v27, %v242_v26  ;;  %v1891_v40 = vpack.c.bf16 %v360_v34, %v352_v33  ;;  %v1959_v26 = vpack.c.bf16 %v330_v22, %v322_v21  ;;  %v1110_v22 = vld [vmem:[#allocation7 + $0x98] sm:$0xff] }
  0xe0   :  { %1922 = vmatprep.subr.bf16.mxu1 %v1921_v41  ;;  %1874 = vmatprep.subr.bf16.mxu0 %v1873_v43  ;;  %v1941_v41 = vpack.c.bf16 %v267_v35, %v259_v31  ;;  %v1893_v43 = vpack.c.bf16 %v377_v37, %v369_v36  ;;  %v355_v31 = vld [vmem:[#allocation2 + $0x7b8] sm:$0xff]  ;;  %v354_v35 = vld [vmem:[#allocation2 + $0x7b0] sm:$0xff] }
  0xe1   :  { %v362_v36 = vld [vmem:[#allocation2 + $0x7f0] sm:$0xff]  ;;  %v371_v37 = vld [vmem:[#allocation2 + $0x838] sm:$0xff] }
  0xe3   :  { %1924 = vmatpush1.bf16.msra.mxu1 %v1923_v49  ;;  %1876 = vmatpush1.bf16.msra.mxu0 %v1875_v53  ;;  %v1943_v49 = vpack.c.bf16 %v266_v6, %v258_v39  ;;  %v1895_v53 = vpack.c.bf16 %v376_v45, %v368_v44  ;;  %v1967_v39 = vpack.c.bf16 %v362_v36, %v354_v35  ;;  %v1122_v36 = vld [vmem:[#allocation7 + $0xf8] sm:$0xff] }
  0xe4   :  { %1926 = vmatprep.subr.bf16.mxu1 %v1925_v54  ;;  %1878 = vmatprep.subr.bf16.mxu0 %v1877_v56  ;;  %v1945_v54 = vpack.c.bf16 %v283_v46, %v275_v42  ;;  %v1897_v56 = vpack.c.bf16 %v393_v48, %v385_v47  ;;  %v387_v42 = vld [vmem:[#allocation2 + $0x8b8] sm:$0xff]  ;;  %v386_v46 = vld [vmem:[#allocation2 + $0x8b0] sm:$0xff] }
  0xe5   :  { %v394_v47 = vld [vmem:[#allocation2 + $0x8f0] sm:$0xff]  ;;  %v403_v48 = vld [vmem:[#allocation2 + $0x938] sm:$0xff] }
  0xe7   :  { %1928 = vmatpush1.bf16.msra.mxu1 %v1927_v62  ;;  %1880 = vmatpush1.bf16.msra.mxu0 %v1879_v3  ;;  %v1947_v62 = vpack.c.bf16 %v282_v51, %v274_v50  ;;  %v1949_v3 = vpack.c.bf16 %v299_v59, %v291_v55  ;;  %v1975_v50 = vpack.c.bf16 %v394_v47, %v386_v46  ;;  %v1094_v59 = vld [vmem:[#allocation7 + $0x18] sm:$0xff] }
  0xe8   :  { %1930 = vmatprep.subr.bf16.mxu1 %v1929_v4  ;;  %1882 = vmatprep.subr.bf16.mxu0 %v1881_v7  ;;  %v298_v4 = vld [vmem:[#allocation2 + $0x5f0] sm:$0xff]  ;;  %v400_v7 = vld [vmem:[#allocation2 + $0x920] sm:$0xff] }
  0xe9   :  { %v1951_v11 = vpack.c.bf16 %v298_v4, %v290_v63  ;;  %v1903_v12 = vpack.c.bf16 %v408_v8, %v400_v7  ;;  %v1095_v63 = vld [vmem:[#allocation7 + $0x20] sm:$0xff]  ;;  %v1093_v4 = vld [vmem:[#allocation7 + $0x10] sm:$0xff]  ;;  %v1100_v7 = vld [vmem:[#allocation7 + $0x48] sm:$0xff] }
  0xeb   :  { %1932 = vmatpush1.bf16.msra.mxu1 %v1931_v13  ;;  %1884 = vmatpush1.bf16.msra.mxu0 %v1883_v16  ;;  %v1953_v13 = vpack.c.bf16 %v315_v10, %v307_v9  ;;  %v323_v16 = vld [vmem:[#allocation2 + $0x6b8] sm:$0xff]  ;;  %v1104_v9 = vld [vmem:[#allocation7 + $0x68] sm:$0xff]  ;;  %v1102_v10 = vld [vmem:[#allocation7 + $0x58] sm:$0xff] }
  0xec   :  { %1934 = vmatprep.subr.bf16.mxu1 %v1933_v17  ;;  %1886 = vmatprep.subr.bf16.mxu0 %v1885_v19  ;;  %v331_v17 = vld [vmem:[#allocation2 + $0x6f8] sm:$0xff]  ;;  %v1955_v19 = vpack.c.bf16 %v314_v15, %v306_v14  ;;  %v1103_v14 = vld [vmem:[#allocation7 + $0x60] sm:$0xff] }
  0xed   :  { %v1957_v20 = vpack.c.bf16 %v331_v17, %v323_v16  ;;  %v1101_v15 = vld [vmem:[#allocation7 + $0x50] sm:$0xff] }
  0xee   :  { %v1105_v17 = vld [vmem:[#allocation7 + $0x70] sm:$0xff] }
  0xef   :  { %1936 = vmatpush1.bf16.msra.mxu1 %v1935_v25  ;;  %1888 = vmatpush1.bf16.msra.mxu0 %v1887_v28  ;;  %v347_v25 = vld [vmem:[#allocation2 + $0x778] sm:$0xff]  ;;  %v338_v28 = vld [vmem:[#allocation2 + $0x730] sm:$0xff] }
  0xf0   :  { %1938 = vmatprep.subr.bf16.mxu1 %v1937_v30  ;;  %1890 = vmatprep.subr.bf16.mxu0 %v1889_v32  ;;  %v1961_v27 = vpack.c.bf16 %v347_v25, %v339_v24  ;;  %v346_v30 = vld [vmem:[#allocation2 + $0x770] sm:$0xff]  ;;  %v363_v32 = vld [vmem:[#allocation2 + $0x7f8] sm:$0xff]  ;;  %v1107_v24 = vld [vmem:[#allocation7 + $0x80] sm:$0xff] }
  0xf1   :  { %v1963_v33 = vpack.c.bf16 %v346_v30, %v338_v28  ;;  %v1965_v34 = vpack.c.bf16 %v363_v32, %v355_v31  ;;  %v1113_v28 = vld [vmem:[#allocation7 + $0xb0] sm:$0xff]  ;;  %v1116_v31 = vld [vmem:[#allocation7 + $0xc8] sm:$0xff] }
  0xf2   :  { %v1120_v32 = vld [vmem:[#allocation7 + $0xe8] sm:$0xff] }
  0xf3   :  { %1940 = vmatpush1.bf16.msra.mxu1 %v1939_v38  ;;  %1892 = vmatpush1.bf16.msra.mxu0 %v1891_v40  ;;  %v379_v38 = vld [vmem:[#allocation2 + $0x878] sm:$0xff]  ;;  %v370_v40 = vld [vmem:[#allocation2 + $0x830] sm:$0xff]  ;;  %v1993_v35 = vpack.c.bf16 %v1120_v32, %v1116_v31  ;;  %v1162_v31 = vld [vmem:[#allocation7 + $0x238] sm:$0xff] }
  0xf4   :  { %1942 = vmatprep.subr.bf16.mxu1 %v1941_v41  ;;  %1894 = vmatprep.subr.bf16.mxu0 %v1893_v43  ;;  %v1969_v6 = vpack.c.bf16 %v379_v38, %v371_v37  ;;  %v378_v41 = vld [vmem:[#allocation2 + $0x870] sm:$0xff]  ;;  %v395_v43 = vld [vmem:[#allocation2 + $0x8f8] sm:$0xff]  ;;  %v1115_v37 = vld [vmem:[#allocation7 + $0xc0] sm:$0xff] }
  0xf5   :  { %v1971_v44 = vpack.c.bf16 %v378_v41, %v370_v40  ;;  %v1973_v45 = vpack.c.bf16 %v395_v43, %v387_v42  ;;  %v1119_v38 = vld [vmem:[#allocation7 + $0xe0] sm:$0xff]  ;;  %v1121_v40 = vld [vmem:[#allocation7 + $0xf0] sm:$0xff]  ;;  %v1124_v41 = vld [vmem:[#allocation7 + $0x108] sm:$0xff] }
  0xf6   :  { %858 = vmatmul.mubr.f32.vlgmr.msra.gmra.mrb[2].mxu0 %v2482_v52  ;;  %v1128_v42 = vld [vmem:[#allocation7 + $0x128] sm:$0xff]  ;;  %v1126_v43 = vld [vmem:[#allocation7 + $0x118] sm:$0xff] }
  0xf7   :  { %1944 = vmatpush1.bf16.msra.mxu1 %v1943_v49  ;;  %1896 = vmatpush1.bf16.msra.mxu0 %v1895_v53  ;;  %v411_v49 = vld [vmem:[#allocation2 + $0x978] sm:$0xff]  ;;  %v402_v53 = vld [vmem:[#allocation2 + $0x930] sm:$0xff]  ;;  %v1997_v47 = vpack.c.bf16 %v1128_v42, %v1124_v41  ;;  %v1166_v41 = vld [vmem:[#allocation7 + $0x258] sm:$0xff] }
  0xf8   :  { %1946 = vmatprep.subr.bf16.mxu1 %v1945_v54  ;;  %1898 = vmatprep.subr.bf16.mxu0 %v1897_v56  ;;  %v1977_v51 = vpack.c.bf16 %v411_v49, %v403_v48  ;;  %v410_v54 = vld [vmem:[#allocation2 + $0x970] sm:$0xff]  ;;  %v419_v56 = vld [vmem:[#allocation2 + $0x9b8] sm:$0xf]  ;;  %v1123_v48 = vld [vmem:[#allocation7 + $0x100] sm:$0xff] }
  0xf9   :  { %928 = vmatprep.mubr.f32.mxu0 %v2347_v0  ;;  %v1979_v55 = vpack.c.bf16 %v410_v54, %v402_v53  ;;  %v1127_v49 = vld [vmem:[#allocation7 + $0x120] sm:$0xff]  ;;  %v1129_v53 = vld [vmem:[#allocation7 + $0x130] sm:$0xff]  ;;  %v1132_v54 = vld [vmem:[#allocation7 + $0x148] sm:$0xff] }
  0xfa   :  { %v1170_v42 = vld [vmem:[#allocation7 + $0x278] sm:$0xff] }
  0xfb   :  { %1948 = vmatpush1.bf16.msra.mxu1 %v1947_v62  ;;  %1900 = vmatpush1.bf16.msra.mxu0 %v1899_v1  ;;  %v1091_v62 = vld [vmem:[#allocation7] sm:$0xff]  ;;  %v2045_v1 = vpack.c.bf16 %v1098_v61, %v1094_v59 }
  0xfc   :  { %1950 = vmatprep.subr.bf16.mxu1 %v1949_v3  ;;  %1902 = vmatprep.subr.bf16.mxu0 %v1901_v5  ;;  %v1983_v3 = vpack.c.bf16 %v1095_v63, %v1091_v62  ;;  %v1097_v5 = vld [vmem:[#allocation7 + $0x30] sm:$0xff]  ;;  %v1135_v61 = vld [vmem:[#allocation7 + $0x160] sm:$0xff] }
  0xfd   :  { %v2047_v8 = vpack.c.bf16 %v1097_v5, %v1093_v4  ;;  %v1133_v62 = vld [vmem:[#allocation7 + $0x150] sm:$0xff]  ;;  %v1144_v4 = vld [vmem:[#allocation7 + $0x1a8] sm:$0xff]  ;;  %v1142_v5 = vld [vmem:[#allocation7 + $0x198] sm:$0xff] }
  0xff   :  { %1952 = vmatpush1.bf16.msra.mxu1 %v1951_v11  ;;  %1904 = vmatpush1.bf16.msra.mxu0 %v1903_v12  ;;  %v1106_v11 = vld [vmem:[#allocation7 + $0x78] sm:$0xff] }
 0x100   :  { %1954 = vmatprep.subr.bf16.mxu1 %v1953_v13  ;;  %1599 = vmatprep.subr.msk.mxu0 %vm484_vm0, %v417_v18  ;;  %v2049_v12 = vpack.c.bf16 %v1106_v11, %v1102_v10  ;;  %v1099_v13 = vld [vmem:[#allocation7 + $0x40] sm:$0xff]  ;;  %v1108_v18 = vld [vmem:[#allocation7 + $0x88] sm:$0xff] }
 0x101   :  { %v1987_v16 = vpack.c.bf16 %v1103_v14, %v1099_v13  ;;  %v1139_v11 = vld [vmem:[#allocation7 + $0x180] sm:$0xff]  ;;  %v1145_v14 = vld [vmem:[#allocation7 + $0x1b0] sm:$0xff] }
 0x103   :  { %1956 = vmatpush1.bf16.msra.mxu1 %v1955_v19  ;;  %1600 = vmatpush1.msk.msra.mxu0 %vm484_vm0, %v416_v23  ;;  %v1112_v19 = vld [vmem:[#allocation7 + $0xa8] sm:$0xff]  ;;  %v1114_v23 = vld [vmem:[#allocation7 + $0xb8] sm:$0xff] }
 0x104   :  { %1958 = vmatprep.subr.bf16.mxu1 %v1957_v20  ;;  %1601 = vmatmul.mubr.msk.f32.vlgmr.msra.gmra.mrb[2].mxu0 %vm481_vm1, %v2485_v2  ;;  %v2051_v20 = vpack.c.bf16 %v1105_v17, %v1101_v15  ;;  %v1989_v21 = vpack.c.bf16 %v1112_v19, %v1108_v18  ;;  %v2053_v25 = vpack.c.bf16 %v1114_v23, %v1110_v22  ;;  %v1148_v15 = vld [vmem:[#allocation7 + $0x1c8] sm:$0xff]  ;;  %v1150_v17 = vld [vmem:[#allocation7 + $0x1d8] sm:$0xff]  ;;  %v1147_v22 = vld [vmem:[#allocation7 + $0x1c0] sm:$0xff] }
 0x105   :  { %v1154_v18 = vld [vmem:[#allocation7 + $0x1f8] sm:$0xff]  ;;  %v1151_v23 = vld [vmem:[#allocation7 + $0x1e0] sm:$0xff] }
 0x106   :  { %v2011_v32 = vpack.c.bf16 %v1151_v23, %v1147_v22  ;;  %v1187_v22 = vld [vmem:[#allocation7 + $0x300] sm:$0xff] }
 0x107   :  { %1960 = vmatpush1.bf16.msra.mxu1 %v1959_v26  ;;  %v1111_v26 = vld [vmem:[#allocation7 + $0xa0] sm:$0xff] }
 0x108   :  { %1962 = vmatprep.subr.bf16.mxu1 %v1961_v27  ;;  %v1109_v27 = vld [vmem:[#allocation7 + $0x90] sm:$0xff]  ;;  %v1991_v30 = vpack.c.bf16 %v1111_v26, %v1107_v24 }
 0x109   :  { %v1149_v24 = vld [vmem:[#allocation7 + $0x1d0] sm:$0xff] }
 0x10a   :  { %v1153_v26 = vld [vmem:[#allocation7 + $0x1f0] sm:$0xff] }
 0x10b   :  { %1964 = vmatpush1.bf16.msra.mxu1 %v1963_v33  ;;  %v1118_v33 = vld [vmem:[#allocation7 + $0xd8] sm:$0xff] }
 0x10c   :  { %1966 = vmatprep.subr.bf16.mxu1 %v1965_v34  ;;  %v2055_v34 = vpack.c.bf16 %v1113_v28, %v1109_v27  ;;  %v1156_v27 = vld [vmem:[#allocation7 + $0x208] sm:$0xff] }
 0x10d   :  { %v1160_v28 = vld [vmem:[#allocation7 + $0x228] sm:$0xff] }
 0x10f   :  { %1968 = vmatpush1.bf16.msra.mxu1 %v1967_v39  ;;  %v2057_v39 = vpack.c.bf16 %v1122_v36, %v1118_v33  ;;  %v2075_v33 = vpack.c.bf16 %v1153_v26, %v1149_v24  ;;  %v1159_v36 = vld [vmem:[#allocation7 + $0x220] sm:$0xff]  ;;  %v1193_v26 = vld [vmem:[#allocation7 + $0x330] sm:$0xff] }
 0x110   :  { %1970 = vmatprep.subr.bf16.mxu1 %v1969_v6  ;;  %v1117_v6 = vld [vmem:[#allocation7 + $0xd0] sm:$0xff]  ;;  %v1191_v24 = vld [vmem:[#allocation7 + $0x320] sm:$0xff] }
 0x111   :  { %v2059_v46 = vpack.c.bf16 %v1121_v40, %v1117_v6  ;;  %v1164_v6 = vld [vmem:[#allocation7 + $0x248] sm:$0xff] }
 0x112   :  { %1000 = vmatmul.mubr.f32.vlgmr.msra.gmra.mrb[4].mxu1 %v2482_v52  ;;  %v1092_v52 = vld [vmem:[#allocation7 + $0x8] sm:$0xff] }
 0x113   :  { %1972 = vmatpush1.bf16.msra.mxu1 %v1971_v44  ;;  %1070 = vmatprep.mubr.f32.mxu1 %v2347_v0  ;;  %v1981_v60 = vpack.c.bf16 %v1096_v58, %v1092_v52  ;;  %v1130_v44 = vld [vmem:[#allocation7 + $0x138] sm:$0xff]  ;;  %v1999_v52 = vpack.c.bf16 %v1127_v49, %v1123_v48  ;;  %v1168_v40 = vld [vmem:[#allocation7 + $0x268] sm:$0xff]  ;;  %v2081_v48 = vpack.c.bf16 %v1170_v42, %v1166_v41  ;;  %v1165_v49 = vld [vmem:[#allocation7 + $0x250] sm:$0xff] }
 0x114   :  { %1974 = vmatprep.subr.bf16.mxu1 %v1973_v45  ;;  %v1995_v45 = vpack.c.bf16 %v1119_v38, %v1115_v37  ;;  %v1157_v37 = vld [vmem:[#allocation7 + $0x210] sm:$0xff]  ;;  %v1204_v41 = vld [vmem:[#allocation7 + $0x388] sm:$0xff] }
 0x115   :  { %1982 = vmatprep.subr.bf16.mxu0 %v1981_v60  ;;  %v1131_v60 = vld [vmem:[#allocation7 + $0x140] sm:$0xff]  ;;  %v1208_v42 = vld [vmem:[#allocation7 + $0x3a8] sm:$0xff] }
 0x116   :  { %1984 = vmatpush1.bf16.msra.mxu0 %v1983_v3  ;;  %v1140_v3 = vld [vmem:[#allocation7 + $0x188] sm:$0xff] }
 0x117   :  { %1976 = vmatpush1.bf16.msra.mxu1 %v1975_v50  ;;  %v1125_v50 = vld [vmem:[#allocation7 + $0x110] sm:$0xff]  ;;  %v2005_v10 = vpack.c.bf16 %v1144_v4, %v1140_v3  ;;  %v1180_v4 = vld [vmem:[#allocation7 + $0x2c8] sm:$0xff] }
 0x118   :  { %1978 = vmatprep.subr.bf16.mxu1 %v1977_v51  ;;  %v2061_v51 = vpack.c.bf16 %v1130_v44, %v1126_v43  ;;  %v2063_v58 = vpack.c.bf16 %v1129_v53, %v1125_v50  ;;  %v1169_v50 = vld [vmem:[#allocation7 + $0x270] sm:$0xff] }
 0x119   :  { %v2083_v53 = vpack.c.bf16 %v1169_v50, %v1165_v49  ;;  %v1177_v3 = vld [vmem:[#allocation7 + $0x2b0] sm:$0xff] }
 0x11a   :  { %v1205_v50 = vld [vmem:[#allocation7 + $0x390] sm:$0xff] }
 0x11b   :  { %1980 = vmatpush1.bf16.msra.mxu1 %v1979_v55  ;;  %v1136_v55 = vld [vmem:[#allocation7 + $0x168] sm:$0xff] }
 0x11c   :  { %1602 = vmatprep.subr.msk.mxu1 %vm484_vm0, %v419_v56  ;;  %v1134_v56 = vld [vmem:[#allocation7 + $0x158] sm:$0xff]  ;;  %v2001_v59 = vpack.c.bf16 %v1136_v55, %v1132_v54 }
 0x11f   :  { %1603 = vmatpush1.msk.msra.mxu1 %vm484_vm0, %v418_v57  ;;  %v1138_v57 = vld [vmem:[#allocation7 + $0x178] sm:$0xff] }
 0x120   :  { %1604 = vmatmul.mubr.msk.f32.vlgmr.msra.gmra.mrb[4].mxu1 %vm481_vm1, %v2485_v2  ;;  %2046 = vmatprep.subr.bf16.mxu1 %v2045_v1  ;;  %v1985_v2 = vpack.c.bf16 %v1104_v9, %v1100_v7  ;;  %v2065_v63 = vpack.c.bf16 %v1138_v57, %v1134_v56  ;;  %v1137_v1 = vld [vmem:[#allocation7 + $0x170] sm:$0xff]  ;;  %v1146_v7 = vld [vmem:[#allocation7 + $0x1b8] sm:$0xff]  ;;  %v1172_v56 = vld [vmem:[#allocation7 + $0x288] sm:$0xff] }
 0x121   :  { %2048 = vmatpush1.bf16.msra.mxu1 %v2047_v8  ;;  %v2003_v8 = vpack.c.bf16 %v1135_v61, %v1131_v60  ;;  %v2067_v9 = vpack.c.bf16 %v1137_v1, %v1133_v62  ;;  %v2069_v13 = vpack.c.bf16 %v1146_v7, %v1142_v5  ;;  %v1176_v57 = vld [vmem:[#allocation7 + $0x2a8] sm:$0xff]  ;;  %v1171_v60 = vld [vmem:[#allocation7 + $0x280] sm:$0xff]  ;;  %v1173_v1 = vld [vmem:[#allocation7 + $0x290] sm:$0xff] }
 0x122   :  { %1986 = vmatprep.subr.bf16.mxu0 %v1985_v2  ;;  %2050 = vmatprep.subr.bf16.mxu1 %v2049_v12  ;;  %v1143_v2 = vld [vmem:[#allocation7 + $0x1a0] sm:$0xff]  ;;  %v1141_v12 = vld [vmem:[#allocation7 + $0x190] sm:$0xff]  ;;  %v2087_v5 = vpack.c.bf16 %v1177_v3, %v1173_v1  ;;  %v1184_v7 = vld [vmem:[#allocation7 + $0x2e8] sm:$0xff] }
 0x123   :  { %1988 = vmatpush1.bf16.msra.mxu0 %v1987_v16  ;;  %v1152_v16 = vld [vmem:[#allocation7 + $0x1e8] sm:$0xff]  ;;  %v2007_v19 = vpack.c.bf16 %v1143_v2, %v1139_v11  ;;  %v1175_v61 = vld [vmem:[#allocation7 + $0x2a0] sm:$0xff]  ;;  %v1213_v1 = vld [vmem:[#allocation7 + $0x3d0] sm:$0xff] }
 0x124   :  { %1990 = vmatprep.subr.bf16.mxu0 %v1989_v21  ;;  %v2009_v21 = vpack.c.bf16 %v1152_v16, %v1148_v15  ;;  %v1179_v2 = vld [vmem:[#allocation7 + $0x2c0] sm:$0xff]  ;;  %v1185_v15 = vld [vmem:[#allocation7 + $0x2f0] sm:$0xff]  ;;  %v1188_v16 = vld [vmem:[#allocation7 + $0x308] sm:$0xff] }
 0x125   :  { %2052 = vmatpush1.bf16.msra.mxu1 %v2051_v20  ;;  %v2071_v20 = vpack.c.bf16 %v1145_v14, %v1141_v12  ;;  %v1183_v12 = vld [vmem:[#allocation7 + $0x2e0] sm:$0xff]  ;;  %v1217_v3 = vld [vmem:[#allocation7 + $0x3f0] sm:$0xff] }
 0x126   :  { %2054 = vmatprep.subr.bf16.mxu1 %v2053_v25  ;;  %v2073_v25 = vpack.c.bf16 %v1154_v18, %v1150_v17  ;;  %v2027_v14 = vpack.c.bf16 %v1183_v12, %v1179_v2  ;;  %v1192_v17 = vld [vmem:[#allocation7 + $0x328] sm:$0xff] }
 0x127   :  { %1992 = vmatpush1.bf16.msra.mxu0 %v1991_v30  ;;  %v1158_v30 = vld [vmem:[#allocation7 + $0x218] sm:$0xff] }
 0x128   :  { %1994 = vmatprep.subr.bf16.mxu0 %v1993_v35  ;;  %v1155_v35 = vld [vmem:[#allocation7 + $0x200] sm:$0xff]  ;;  %v2077_v38 = vpack.c.bf16 %v1162_v31, %v1158_v30  ;;  %v1200_v30 = vld [vmem:[#allocation7 + $0x368] sm:$0xff]  ;;  %v1198_v31 = vld [vmem:[#allocation7 + $0x358] sm:$0xff] }
 0x129   :  { %2056 = vmatpush1.bf16.msra.mxu1 %v2055_v34  ;;  %v2013_v34 = vpack.c.bf16 %v1160_v28, %v1156_v27  ;;  %v2015_v43 = vpack.c.bf16 %v1159_v36, %v1155_v35  ;;  %v2031_v27 = vpack.c.bf16 %v1191_v24, %v1187_v22  ;;  %v1196_v28 = vld [vmem:[#allocation7 + $0x348] sm:$0xff]  ;;  %v1195_v36 = vld [vmem:[#allocation7 + $0x340] sm:$0xff] }
 0x12a   :  { %2058 = vmatprep.subr.bf16.mxu1 %v2057_v39  ;;  %v1161_v39 = vld [vmem:[#allocation7 + $0x230] sm:$0xff] }
 0x12b   :  { %1996 = vmatpush1.bf16.msra.mxu0 %v1995_v45  ;;  %v2079_v44 = vpack.c.bf16 %v1161_v39, %v1157_v37  ;;  %v2017_v45 = vpack.c.bf16 %v1168_v40, %v1164_v6  ;;  %v1199_v37 = vld [vmem:[#allocation7 + $0x360] sm:$0xff]  ;;  %v1201_v6 = vld [vmem:[#allocation7 + $0x370] sm:$0xff] }
 0x12c   :  { %1998 = vmatprep.subr.bf16.mxu0 %v1997_v47  ;;  %v1167_v47 = vld [vmem:[#allocation7 + $0x260] sm:$0xff]  ;;  %v2035_v39 = vpack.c.bf16 %v1199_v37, %v1195_v36 }
 0x12d   :  { %2060 = vmatpush1.bf16.msra.mxu1 %v2059_v46  ;;  %v1163_v46 = vld [vmem:[#allocation7 + $0x240] sm:$0xff] }
 0x12e   :  { %2062 = vmatprep.subr.bf16.mxu1 %v2061_v51  ;;  %v2019_v51 = vpack.c.bf16 %v1167_v47, %v1163_v46  ;;  %v1203_v46 = vld [vmem:[#allocation7 + $0x380] sm:$0xff] }
 0x12f   :  { %2000 = vmatpush1.bf16.msra.mxu0 %v1999_v52  ;;  %v1174_v52 = vld [vmem:[#allocation7 + $0x298] sm:$0xff]  ;;  %v1207_v47 = vld [vmem:[#allocation7 + $0x3a0] sm:$0xff] }
 0x130   :  { %2002 = vmatprep.subr.bf16.mxu0 %v2001_v59  ;;  %v1178_v59 = vld [vmem:[#allocation7 + $0x2b8] sm:$0xff]  ;;  %v2039_v49 = vpack.c.bf16 %v1207_v47, %v1203_v46 }
 0x131   :  { %2064 = vmatpush1.bf16.msra.mxu1 %v2063_v58  ;;  %v2021_v58 = vpack.c.bf16 %v1176_v57, %v1172_v56  ;;  %v2085_v62 = vpack.c.bf16 %v1178_v59, %v1174_v52  ;;  %v1212_v56 = vld [vmem:[#allocation7 + $0x3c8] sm:$0xff]  ;;  %v1214_v52 = vld [vmem:[#allocation7 + $0x3d8] sm:$0xff] }
 0x132   :  { %2066 = vmatprep.subr.bf16.mxu1 %v2065_v63  ;;  %v2023_v63 = vpack.c.bf16 %v1175_v61, %v1171_v60  ;;  %v1216_v57 = vld [vmem:[#allocation7 + $0x3e8] sm:$0xff]  ;;  %v1218_v59 = vld [vmem:[#allocation7 + $0x3f8] sm:$0xff]  ;;  %v1211_v60 = vld [vmem:[#allocation7 + $0x3c0] sm:$0xff] }
 0x133   :  { %2004 = vmatpush1.bf16.msra.mxu0 %v2003_v8  ;;  %v1182_v8 = vld [vmem:[#allocation7 + $0x2d8] sm:$0xff]  ;;  %v1215_v61 = vld [vmem:[#allocation7 + $0x3e0] sm:$0xff] }
 0x134   :  { %2006 = vmatprep.subr.bf16.mxu0 %v2005_v10  ;;  %v2025_v10 = vpack.c.bf16 %v1184_v7, %v1180_v4  ;;  %v2107_v4 = vpack.c.bf16 %v1217_v3, %v1213_v1  ;;  %v424_v7 = vsub.s32 0, %v2476_v29  ;;  %v1396_v1 = vld [vmem:[%s2636_s5 + $0x30] sm:$0xff]  ;;  %v1397_v3 = vld [vmem:[%s2636_s5 + $0x38] sm:$0xff] }
 0x135   :  { %2068 = vmatpush1.bf16.msra.mxu1 %v2067_v9  ;;  %v1186_v9 = vld [vmem:[#allocation7 + $0x2f8] sm:$0xff] }
 0x136   :  { %2070 = vmatprep.subr.bf16.mxu1 %v2069_v13  ;;  %v2089_v11 = vpack.c.bf16 %v1186_v9, %v1182_v8  ;;  %v1181_v13 = vld [vmem:[#allocation7 + $0x2d0] sm:$0xff]  ;;  %v420_v8 = vld [vmem:[#allocation5] sm:$0xff]  ;;  %v428_v9 = vsub.s32 1, %v2476_v29 }
 0x137   :  { %2008 = vmatpush1.bf16.msra.mxu0 %v2007_v19  ;;  %v2091_v18 = vpack.c.bf16 %v1185_v15, %v1181_v13  ;;  %v2029_v19 = vpack.c.bf16 %v1192_v17, %v1188_v16  ;;  %v432_v17 = vsub.s32 2, %v2476_v29 }
 0x138   :  { %2010 = vmatprep.subr.bf16.mxu0 %v2009_v21  ;;  %v1194_v21 = vld [vmem:[#allocation7 + $0x338] sm:$0xff] }
 0x139   :  { %2072 = vmatpush1.bf16.msra.mxu1 %v2071_v20  ;;  %v1190_v20 = vld [vmem:[#allocation7 + $0x318] sm:$0xff] }
 0x13a   :  { %2074 = vmatprep.subr.bf16.mxu1 %v2073_v25  ;;  %v2093_v23 = vpack.c.bf16 %v1194_v21, %v1190_v20  ;;  %v1189_v25 = vld [vmem:[#allocation7 + $0x310] sm:$0xff] }
 0x13b   :  { %2012 = vmatpush1.bf16.msra.mxu0 %v2011_v32  ;;  %v2095_v32 = vpack.c.bf16 %v1193_v26, %v1189_v25 }
 0x13c   :  { %2014 = vmatprep.subr.bf16.mxu0 %v2013_v34  ;;  %v1202_v34 = vld [vmem:[#allocation7 + $0x378] sm:$0xff] }
 0x13d   :  { %2076 = vmatpush1.bf16.msra.mxu1 %v2075_v33  ;;  %v2033_v33 = vpack.c.bf16 %v1200_v30, %v1196_v28  ;;  %v2097_v35 = vpack.c.bf16 %v1202_v34, %v1198_v31  ;;  %v448_v34 = vsub.s32 6, %v2476_v29 }
 0x13e   :  { %2078 = vmatprep.subr.bf16.mxu1 %v2077_v38  ;;  %v1197_v38 = vld [vmem:[#allocation7 + $0x350] sm:$0xff] }
 0x13f   :  { %2016 = vmatpush1.bf16.msra.mxu0 %v2015_v43  ;;  %v2099_v40 = vpack.c.bf16 %v1201_v6, %v1197_v38  ;;  %v1206_v43 = vld [vmem:[#allocation7 + $0x398] sm:$0xff]  ;;  %v449_v38 = vrot.slane %v420_v8, %v448_v34 }
 0x140   :  { %2018 = vmatprep.subr.bf16.mxu0 %v2017_v45  ;;  %v1210_v45 = vld [vmem:[#allocation7 + $0x3b8] sm:$0xff] }
 0x141   :  { %2080 = vmatpush1.bf16.msra.mxu1 %v2079_v44  ;;  %v2037_v44 = vpack.c.bf16 %v1208_v42, %v1204_v41 }
 0x142   :  { %2082 = vmatprep.subr.bf16.mxu1 %v2081_v48  ;;  %v2101_v48 = vpack.c.bf16 %v1210_v45, %v1206_v43 }
 0x143   :  { %2020 = vmatpush1.bf16.msra.mxu0 %v2019_v51  ;;  %v1209_v51 = vld [vmem:[#allocation7 + $0x3b0] sm:$0xff] }
 0x144   :  { %2022 = vmatprep.subr.bf16.mxu0 %v2021_v58  ;;  %v2041_v58 = vpack.c.bf16 %v1216_v57, %v1212_v56 }
 0x145   :  { %2084 = vmatpush1.bf16.msra.mxu1 %v2083_v53  ;;  %v2103_v53 = vpack.c.bf16 %v1209_v51, %v1205_v50  ;;  %v1390_v50 = vld [vmem:[%s2636_s5] sm:$0xff]  ;;  %v1391_v51 = vld [vmem:[%s2636_s5 + $0x8] sm:$0xff] }
 0x146   :  { %2086 = vmatprep.subr.bf16.mxu1 %v2085_v62  ;;  %v2105_v62 = vpack.c.bf16 %v1218_v59, %v1214_v52  ;;  %v2110_v52 = vpack.c.bf16 %v1391_v51, %v1390_v50  ;;  %v1393_v59 = vld [vmem:[%s2636_s5 + $0x18] sm:$0xff] }
 0x147   :  { %2024 = vmatpush1.bf16.msra.mxu0 %v2023_v63  ;;  %v2043_v63 = vpack.c.bf16 %v1215_v61, %v1211_v60  ;;  %v1394_v61 = vld [vmem:[%s2636_s5 + $0x20] sm:$0xff] }
 0x148   :  { %2026 = vmatprep.subr.bf16.mxu0 %v2025_v10  ;;  %v425_v10 = vrot.slane %v420_v8, %v424_v7 }
 0x149   :  { %2088 = vmatpush1.bf16.msra.mxu1 %v2087_v5  ;;  %v2349_v5 = vmov 0.0|0.0  }
 0x14a   :  { %2090 = vmatprep.subr.bf16.mxu1 %v2089_v11  ;;  %v429_v11 = vrot.slane %v420_v8, %v428_v9 }
 0x14b   :  { %2028 = vmatpush1.bf16.msra.mxu0 %v2027_v14 }
 0x14c   :  { %2030 = vmatprep.subr.bf16.mxu0 %v2029_v19  ;;  %v433_v19 = vrot.slane %v420_v8, %v432_v17 }
 0x14d   :  { %2092 = vmatpush1.bf16.msra.mxu1 %v2091_v18  ;;  %v436_v18 = vsub.s32 3, %v2476_v29 }
 0x14e   :  { %2094 = vmatprep.subr.bf16.mxu1 %v2093_v23 }
 0x14f   :  { %2032 = vmatpush1.bf16.msra.mxu0 %v2031_v27  ;;  %v437_v20 = vrot.slane %v420_v8, %v436_v18 }
 0x150   :  { %2034 = vmatprep.subr.bf16.mxu0 %v2033_v33  ;;  %v444_v33 = vsub.s32 5, %v2476_v29 }
 0x151   :  { %2096 = vmatpush1.bf16.msra.mxu1 %v2095_v32  ;;  %v440_v32 = vsub.s32 4, %v2476_v29 }
 0x152   :  { %2098 = vmatprep.subr.bf16.mxu1 %v2097_v35  ;;  %v452_v35 = vsub.s32 7, %v2476_v29  ;;  %v445_v37 = vrot.slane %v420_v8, %v444_v33  ;;  %v1486_v29 = vld [vmem:[%s2638_s7 + $0x10] sm:$0xff] }
 0x153   :  { %2036 = vmatpush1.bf16.msra.mxu0 %v2035_v39  ;;  %v441_v36 = vrot.slane %v420_v8, %v440_v32 }
 0x154   :  { %2038 = vmatprep.subr.bf16.mxu0 %v2037_v44  ;;  %v453_v39 = vrot.slane %v420_v8, %v452_v35  ;;  %v1398_v8 = vld [vmem:[%s2636_s5 + $0x40] sm:$0xff] }
 0x155   :  { %2100 = vmatpush1.bf16.msra.mxu1 %v2099_v40 }
 0x156   :  { %v2517_v54 = vpop.f32.mrb[0].mxu1  ;;  %2102 = vmatprep.subr.bf16.mxu1 %v2101_v48 }
 0x157   :  { %v2519_v55 = vpop.f32.mrb[1].mxu1  ;;  %2040 = vmatpush1.bf16.msra.mxu0 %v2039_v49 }
 0x158   :  { %2042 = vmatprep.subr.bf16.mxu0 %v2041_v58  ;;  %v1392_v58 = vld [vmem:[%s2636_s5 + $0x10] sm:$0xff] }
 0x159   :  { %2104 = vmatpush1.bf16.msra.mxu1 %v2103_v53  ;;  %v2113_v60 = vpack.c.bf16 %v1393_v59, %v1392_v58 }
 0x15a   :  { %2106 = vmatprep.subr.bf16.mxu1 %v2105_v62  ;;  %v1395_v62 = vld [vmem:[%s2636_s5 + $0x28] sm:$0xff] }
 0x15b   :  { %2044 = vmatpush1.bf16.msra.mxu0 %v2043_v63  ;;  %v2116_v63 = vpack.c.bf16 %v1395_v62, %v1394_v61 }
 0x15c   :  { %2109 = vmatprep.subr.bf16.mxu0 %v2349_v5 }
 0x15d   :  { %2108 = vmatpush1.bf16.msra.mxu1 %v2107_v4  ;;  %v2119_v4 = vpack.c.bf16 %v1397_v3, %v1396_v1 }
 0x15e   :  { %2133 = vmatprep.subr.bf16.mxu1 %v2349_v5 }
 0x187   :  { %v575_v2 = vpop.f32.mrb[0].mxu0 }
 0x188   :  { %v576_v12 = vadd.f32 %v575_v2, %v425_v10  ;;  %v577_v13 = vpop.f32.mrb[1].mxu0  ;;  %v1399_v10 = vld [vmem:[%s2636_s5 + $0x48] sm:$0xff]  ;;  %v1400_v2 = vld [vmem:[%s2636_s5 + $0x50] sm:$0xff] }
 0x189   :  { %v578_v14 = vadd.f32 %v577_v13, %v429_v11  ;;  %v2122_v11 = vpack.c.bf16 %v1399_v10, %v1398_v8 }
 0x18a   :  { %v647_v15 = vadd.f32 %v2517_v54, %v576_v12  ;;  %v1401_v12 = vld [vmem:[%s2636_s5 + $0x58] sm:$0xff] }
 0x18b   :  { %v649_v16 = vadd.f32 %v2519_v55, %v578_v14  ;;  %v2125_v13 = vpack.c.bf16 %v1401_v12, %v1400_v2  ;;  %v1402_v14 = vld [vmem:[%s2636_s5 + $0x60] sm:$0xff] }
 0x18c   :  { %v1077_v25 = vmax.f32 %v647_v15, 0.0  ;;  %v1403_v15 = vld [vmem:[%s2636_s5 + $0x68] sm:$0xff] }
 0x18d   :  { %v1078_v27 = vmax.f32 %v649_v16, 0.0  ;;  %v2128_v16 = vpack.c.bf16 %v1403_v15, %v1402_v14 }
 0x1a5   :  { %v788_v21 = vpop.f32.mrb[2].mxu1 }
 0x1a6   :  { %v2144_v22 = vadd.f32 %v788_v21, %v433_v19  ;;  %v790_v23 = vpop.f32.mrb[3].mxu1  ;;  %v1404_v19 = vld [vmem:[%s2636_s5 + $0x70] sm:$0xff] }
 0x1a7   :  { %v2145_v24 = vadd.f32 %v790_v23, %v437_v20  ;;  %v1405_v20 = vld [vmem:[%s2636_s5 + $0x78] sm:$0xff]  ;;  %v1485_v23 = vld [vmem:[%s2638_s7 + $0x8] sm:$0xff] }
 0x1a8   :  { %v1079_v26 = vmax.f32 %v2144_v22, 0.0  ;;  %v2131_v21 = vpack.c.bf16 %v1405_v20, %v1404_v19  ;;  %v1484_v22 = vld [vmem:[%s2638_s7] sm:$0xff] }
 0x1a9   :  { %v1080_v54 = vmax.f32 %v2145_v24, 0.0  ;;  %v2134_v24 = vpack.c.bf16 %v1485_v23, %v1484_v22 }
 0x1aa   :  { %v1085_v28 = vmax.f32 %v1077_v25, %v1079_v26  ;;  %v1219_v25 = vld [vmem:[#allocation8] sm:$0xf] }
 0x1ab   :  { %v1086_v55 = vmax.f32 %v1078_v27, %v1080_v54  ;;  %v1224_v26 = vrot.slane %v1219_v25, %v424_v7  ;;  %v1232_v27 = vrot.slane %v1219_v25, %v432_v17  ;;  %v1236_v54 = vrot.slane %v1219_v25, %v436_v18 }
 0x1d7   :  { %v930_v30 = vpop.f32.mrb[2].mxu0 }
 0x1d8   :  { %v932_v31 = vpop.f32.mrb[3].mxu0  ;;  %v2146_v6 = vadd.f32 %v930_v30, %v441_v36 }
 0x1d9   :  { %v2147_v40 = vadd.f32 %v932_v31, %v445_v37 }
 0x1da   :  { %v1081_v45 = vmax.f32 %v2146_v6, 0.0  ;;  %v1605_v6 = vld [vmem:[#allocation10] ss:$0 sm:$0xff] }
 0x1db   :  { %v1082_v47 = vmax.f32 %v2147_v40, 0.0 }
 0x1f3   :  { %v1072_v41 = vpop.f32.mrb[4].mxu1 }
 0x1f4   :  { %v2148_v42 = vadd.f32 %v1072_v41, %v449_v38  ;;  %v1074_v43 = vpop.f32.mrb[5].mxu1 }
 0x1f5   :  { %v2149_v44 = vadd.f32 %v1074_v43, %v453_v39 }
 0x1f6   :  { %v1083_v46 = vmax.f32 %v2148_v42, 0.0 }
 0x1f7   :  { %v1084_v48 = vmax.f32 %v2149_v44, 0.0  ;;  %v1606_v44 = vld [vmem:[#allocation11] ss:$0 sm:$0xff] }
 0x1f8   :  { %v1087_v49 = vmax.f32 %v1081_v45, %v1083_v46 }
 0x1f9   :  { %v1088_v53 = vmax.f32 %v1082_v47, %v1084_v48 }
 0x1fa   :  { %v1089_v56 = vmax.f32 %v1085_v28, %v1087_v49 }
 0x1fb   :  { %v1090_v57 = vmax.f32 %v1086_v55, %v1088_v53 }
 0x1fd   :  { %1305 = vmatprep.mubr.f32.mxu0 %v1090_v57  ;;  %1376 = vmatprep.mubr.f32.mxu1 %v1090_v57 }
 0x1fe   :  { %1306 = vmatmul.mubr.f32.vlgmr.msra.gmra.mrb[4].mxu0 %v1089_v56  ;;  %1377 = vmatmul.mubr.f32.vlgmr.msra.gmra.mrb[6].mxu1 %v1089_v56 }
 0x1ff   :  { %2111 = vmatpush3.bf16.msra.mxu0 %v2110_v52  ;;  %1663 = vmatprep.mubr.msk.f32.mxu0 %vm2350_vm2, %v2347_v0 }
 0x200   :  { %2112 = vmatprep.subr.bf16.mxu0 %v2349_v5  ;;  %1674 = vmatprep.mubr.msk.f32.mxu1 %vm2350_vm2, %v2347_v0  ;;  %v1228_v0 = vrot.slane %v1219_v25, %v428_v9  ;;  %v1487_v9 = vld [vmem:[%s2638_s7 + $0x18] sm:$0x7]  ;;  %s2305_s7 = scalar_lea.vmem %s1582_s25, 32 }
 0x201   :  { %2135 = vmatpush3.bf16.msra.mxu1 %v2134_v24  ;;  %v2137_v18 = vpack.c.bf16 %v1487_v9, %v1486_v29  ;;  %p2306_p6 = scmp.ne.s32.totalorder %s1582_s25, %s2305_s7  ;;  %p2311_p8 = scmp.lt.s32.totalorder %s2305_s7, %s2305_s7 }
 0x202   :  { %2136 = vmatprep.subr.bf16.mxu1 %v2349_v5 }
 0x203   :  { %2114 = vmatpush3.bf16.msra.mxu0 %v2113_v60  ;;  %p2312_p9 = por %p2311_p8, %p2310_p7 }
 0x204   :  { %2115 = vmatprep.subr.bf16.mxu0 %v2349_v5 }
 0x205   :  { %2139 = vmatpush3.bf16.msk.msra.mxu1 %vm2138_vm5, %v2137_v18  ;;  %p2313_p10 = pnand %p2312_p9, %p2306_p6 }
 0x207   :  { %2117 = vmatpush3.bf16.msra.mxu0 %v2116_v63 }
 0x208   :  { %2118 = vmatprep.subr.bf16.mxu0 %v2349_v5 }
 0x20b   :  { %2120 = vmatpush3.bf16.msra.mxu0 %v2119_v4 }
 0x20c   :  { %2121 = vmatprep.subr.bf16.mxu0 %v2349_v5 }
 0x20f   :  { %2123 = vmatpush3.bf16.msra.mxu0 %v2122_v11 }
 0x210   :  { %2124 = vmatprep.subr.bf16.mxu0 %v2349_v5 }
 0x213   :  { %2126 = vmatpush3.bf16.msra.mxu0 %v2125_v13 }
 0x214   :  { %2127 = vmatprep.subr.bf16.mxu0 %v2349_v5 }
 0x217   :  { %2129 = vmatpush3.bf16.msra.mxu0 %v2128_v16 }
 0x218   :  { %2130 = vmatprep.subr.bf16.mxu0 %v2349_v5 }
 0x21b   :  { %2132 = vmatpush3.bf16.msra.mxu0 %v2131_v21 }
 0x2d1   :  { %v1307_v28 = vpop.f32.mrb[4].mxu0  ;;  %v1378_v55 = vpop.f32.mrb[6].mxu1 }
 0x2d2   :  { %v1308_v30 = vadd.f32 %v1307_v28, %v1224_v26  ;;  %v1379_v31 = vadd.f32 %v1378_v55, %v1232_v27  ;;  %v1309_v32 = vpop.f32.mrb[5].mxu0  ;;  %v1380_v33 = vpop.f32.mrb[7].mxu1 }
 0x2d3   :  { %v1310_v5 = vadd.f32 %v1309_v32, %v1228_v0  ;;  %v1381_v34 = vadd.f32 %v1380_v33, %v1236_v54 }
 0x2d4   :  { %v1383_v35 = vmax.f32 %v1308_v30, 0.0  ;;  %v1385_v36 = vmax.f32 %v1379_v31, 0.0 }
 0x2d5   :  { %v1384_v7 = vmax.f32 %v1310_v5, 0.0  ;;  %v1386_v37 = vmax.f32 %v1381_v34, 0.0 }
 0x2d7   :  { %v1387_v38 = vmax.f32 %v1383_v35, %v1384_v7  ;;  %v1388_v17 = vmax.f32 %v1385_v36, %v1386_v37 }
 0x2d9   :  { %v1389_v39 = vmax.f32 %v1387_v38, %v1388_v17 }
 0x2db   :  { %1664 = vmatmul.mubr.f32.vlgmr.msra.gmra.mrb[6].mxu0 %v1389_v39 }
 0x3ae   :  { %v1479_v40 = vpop.f32.mrb[6].mxu0 }
 0x3af   :  { %v1480_v41 = vadd.f32 %v1605_v6, %v1479_v40  ;;  %v1665_v42 = vpop.f32.mrb[7].mxu0 }
 0x3b1   :  { %v1483_v43 = vmax.f32 %v1480_v41, 0.0 }
 0x3b3   :  { %1675 = vmatmul.mubr.msk.f32.vlgmr.msra.gmra.mrb[8].mxu1 %vm1495_vm6, %v1483_v43 }
 0x486   :  { %v1569_v45 = vpop.f32.mrb[8].mxu1 }
 0x487   :  { %v1570_v46 = vadd.f32 %v1606_v44, %v1569_v45  ;;  %v1676_v47 = vpop.f32.mrb[9].mxu1 }
 0x489   :  { %1574 = vst.msk [vmem:[#allocation13] sm:$0x3] %vm1573_vm7, %v1570_v46 }
 0x48a   :  { %2316 = shalt.err (!%p2313_p10)
}
 0x48b   :  { %s2317_s28 = scalar_lea.hbm %s2640_s9, 32 }
 0x48c   :  { %p2318_p11 = scmp.ne.s32.totalorder %s2640_s9, %s2317_s28  ;;  %p2321_p12 = scmp.lt.u32.totalorder %s2317_s28, %s2640_s9 }
 0x48e   :  { %p2323_p13 = pnand %p2321_p12, %p2318_p11 }
 0x490   :  { %2326 = shalt.err (!%p2323_p13)
}
 0x491   :  { %1584 = dma.vmem_to_hbm [thread:$0]  %s1582_s25, 32, %s2640_s9, [#allocation4]  }
 0x492   :  { %2335 = dma.done.wait [#allocation4], 32  }
 0x493   :  { %2336 = vsyncadd [#allocation4], 4294967264 }
 0x494   :  { %1588 = vsyncpa [#allocation3], 1 }
 0x495   :  { %1589 = vsyncpa [#allocation6], 1 }
 0x496   :  { %1590 = vsyncpa [#allocation9], 1 }
 0x497   :  { %1591 = vsyncpa [#allocation12], 1 }
 0x498   :  { %1592 = vsyncpa [#allocation4], 1 }

</bundles_post_ra>
